<compile_context>
chip_gen: v7x
topology: tpu7x:2x2x1
jax: 0.10.0
libtpu: 0.0.40
codegen_flags: <defaults>
</compile_context>

<pallas_src>
import jax
import jax.numpy as jnp
from jax.experimental import pallas as pl
from jax.experimental.pallas import tpu as pltpu


_LANE = 128
_NEG_BIG = 1e30


def _round_up(v, m):
    return (v + m - 1) // m * m


def _pad2(a, rows, cols):
    return jnp.pad(a, ((0, rows - a.shape[0]), (0, cols - a.shape[1])))


# ----------------------------- Pallas kernel ------------------------------ #

def _fused_gat_kernel(x_ref, mask_ref,
                      w1_ref, a1_ref, b1_ref,
                      w2_ref, a2_ref, b2_ref,
                      w3_ref, a3_ref, b3_ref,
                      out_ref):
    """Three fused GAT layers for one graph; intermediates stay in VMEM/vregs."""
    mask = mask_ref[...].astype(jnp.float32)            # [Np, Np] additive 0/-1e30

    def gat_layer(x_bf16, w_ref, att_ref, bias_ref, relu):
        # Node transform on the MXU (bf16 operands, f32 accumulation).
        h = jnp.dot(x_bf16, w_ref[...],
                    preferred_element_type=jnp.float32)              # [Np, Fp]
        h_bf16 = h.astype(jnp.bfloat16)

        # Both attention logits from one small matmul:
        #   att_ref = [Fp, 128] with col0 = att_dst, col1 = att_src (rest zero).
        logits = jnp.dot(h_bf16, att_ref[...],
                         preferred_element_type=jnp.float32)          # [Np, 128]
        a_dst = logits[:, 0:1]                                        # [Np, 1]
        a_src = logits.T[1:2, :]                                      # [1, Np] (XLU)

        e0 = a_dst + a_src                                            # [Np, Np]
        e = jnp.maximum(e0, 0.2 * e0)                                 # LeakyReLU(0.2)

        # Masked softmax over source nodes j (additive mask, no selects).
        masked = e + mask
        m = jnp.max(masked, axis=-1, keepdims=True)                   # [Np, 1]
        p = jnp.exp(masked - m)                                       # 0 off-edge
        denom = jnp.sum(p, axis=-1, keepdims=True)                    # [Np, 1]

        # Aggregate first, normalize after (no [N,N] alpha temporary).
        acc = jnp.dot(p.astype(jnp.bfloat16), h_bf16,
                      preferred_element_type=jnp.float32)             # [Np, Fp]
        out = acc * pl.reciprocal(denom, approx=True) + bias_ref[...]
        if relu:
            out = jnp.maximum(out, 0.0)
        return out

    h1 = gat_layer(x_ref[...], w1_ref, a1_ref, b1_ref, relu=True)
    h2 = gat_layer(h1.astype(jnp.bfloat16), w2_ref, a2_ref, b2_ref, relu=True)
    h3 = gat_layer(h2.astype(jnp.bfloat16), w3_ref, a3_ref, b3_ref, relu=False)
    out_ref[...] = h3.astype(out_ref.dtype)                           # lane-dense vst


def _fused_gat_batched(x_pad, mask, params):
    """x_pad: [B, Np, Fin_p] bf16, mask: [B, Np, Np] bf16 additive."""
    batch, n_pad, f_in_pad = x_pad.shape
    f_out_pad = params[2]["w"].shape[1]

    def per_graph(shape):
        return pl.BlockSpec((None,) + shape, lambda b: (b, 0, 0))

    def shared(shape):
        return pl.BlockSpec(shape, lambda b: (0, 0))     # resident across the grid

    in_specs = [per_graph((n_pad, f_in_pad)), per_graph((n_pad, n_pad))]
    args = [x_pad, mask]
    for p in params:
        in_specs += [shared(p["w"].shape), shared(p["att"].shape),
                     shared(p["bias"].shape)]
        args += [p["w"], p["att"], p["bias"]]

    return pl.pallas_call(
        _fused_gat_kernel,
        out_shape=jax.ShapeDtypeStruct((batch, n_pad, f_out_pad), jnp.float32),
        grid=(batch,),
        in_specs=in_specs,
        out_specs=pl.BlockSpec((None, n_pad, f_out_pad), lambda b: (b, 0, 0)),
        compiler_params=pltpu.CompilerParams(
            dimension_semantics=("parallel",),
            vmem_limit_bytes=32 * 1024 * 1024),
    )(*args)


# ----------------------------- Model wrapper ------------------------------ #

def _glorot(key, shape):
    fan_in, fan_out = shape
    limit = (6.0 / (fan_in + fan_out)) ** 0.5
    return jax.random.uniform(key, shape, jnp.float32, -limit, limit)


def init_gat_params(key, num_node_features):
    """GATConv(F0->48) -> GATConv(48->60) -> GATConv(60->1), padded to 128."""
    dims = [(num_node_features, 48), (48, 60), (60, 1)]
    params = []
    for i, (fi, fo) in enumerate(dims):
        k_w, k_as, k_ad = jax.random.split(jax.random.fold_in(key, i), 3)
        fi_p = _round_up(fi, _LANE)
        fo_p = _round_up(fo, _LANE)
        w = _pad2(_glorot(k_w, (fi, fo)), fi_p, fo_p)
        att_src = _glorot(k_as, (1, fo))
        att_dst = _glorot(k_ad, (1, fo))
        # Combined attention matrix: col 0 = att_dst, col 1 = att_src.
        att = jnp.zeros((fo_p, _LANE), jnp.float32)
        att = att.at[:fo, 0].set(att_dst[0])
        att = att.at[:fo, 1].set(att_src[0])
        params.append(dict(
            w=w.astype(jnp.bfloat16),
            att=att.astype(jnp.bfloat16),
            bias=jnp.zeros((1, fo_p), jnp.float32),
            f_out=fo,
        ))
    return params


def build_attention_mask(edge_index, num_nodes, num_nodes_padded):
    """Additive mask (bf16): 0 where edge j->i exists (incl. self-loops), -1e30 else."""
    src = edge_index[0]
    dst = edge_index[1]
    adj = jnp.zeros((num_nodes_padded, num_nodes_padded), jnp.float32)
    adj = adj.at[dst, src].set(1.0)
    idx = jnp.arange(num_nodes)
    adj = adj.at[idx, idx].set(1.0)           # self-loops (PyG add_self_loops=True)
    return ((adj - 1.0) * _NEG_BIG).astype(jnp.bfloat16)


def gat_model_forward_batched(params, x_list, edge_index_list, edge_attr=None):
    """Batch of same-sized graphs -> [B, num_nodes]. edge_attr is ignored."""
    del edge_attr
    n = x_list[0].shape[0]
    n_pad = _round_up(max(n, 8), _LANE)
    f_in_pad = params[0]["w"].shape[0]

    x_pad = jnp.stack([_pad2(x, n_pad, f_in_pad) for x in x_list]
                      ).astype(jnp.bfloat16)                       # [B, Np, Fin_p]
    mask = jnp.stack([build_attention_mask(ei, n, n_pad)
                      for ei in edge_index_list])                  # [B, Np, Np]

    out_pad = _fused_gat_batched(x_pad, mask, params)              # [B, Np, F3_p]
    f_out = params[2]["f_out"]
    # conv3 real output width is 1 -> equivalent of torch's x.flatten() per graph.
    return out_pad[:, :n, :f_out].reshape(len(x_list), -1)


def gat_model_forward(params, x, edge_index, edge_attr=None):
    """Single-graph forward, matching GATModel.forward (returns [num_nodes])."""
    return gat_model_forward_batched(params, [x], [edge_index], edge_attr)[0]


# --------------------------------- Main ----------------------------------- #

if __name__ == "__main__":
    key = jax.random.PRNGKey(0)

    num_nodes = 16
    num_node_features = 8
    num_edges = 40
    batch = 4

    k_p, k_data = jax.random.split(key)
    params = init_gat_params(k_p, num_node_features)

    xs, eis = [], []
    for g in range(batch):
        kg = jax.random.fold_in(k_data, g)
        k_x, k_s, k_d = jax.random.split(kg, 3)
        xs.append(jax.random.normal(k_x, (num_nodes, num_node_features), jnp.float32))
        src = jax.random.randint(k_s, (num_edges,), 0, num_nodes, jnp.int32)
        dst = jax.random.randint(k_d, (num_edges,), 0, num_nodes, jnp.int32)
        eis.append(jnp.stack([src, dst], axis=0))                  # [2, E]
    edge_attr = jax.random.normal(jax.random.fold_in(k_data, 99),
                                  (num_edges, 4), jnp.float32)     # unused

    # Batched path: one pallas_call, grid=(B,), parallel across graphs.
    out_b = gat_model_forward_batched(params, xs, eis, edge_attr)
    out_b = jax.block_until_ready(out_b)
    assert out_b.shape == (batch, num_nodes), out_b.shape
    assert bool(jnp.all(jnp.isfinite(out_b)))

    # Single-graph forward matching GATModel.forward semantics.
    out1 = gat_model_forward(params, xs[0], eis[0], edge_attr)
    out1 = jax.block_until_ready(out1)
    assert out1.shape == (num_nodes,), out1.shape
    assert bool(jnp.all(jnp.isfinite(out1)))
    assert bool(jnp.allclose(out1, out_b[0], atol=1e-4, rtol=1e-4))

    print("KERNEL_OK")
</pallas_src>

<mosaic_0001>
module attributes {stable_mosaic.version = 11 : i64} {
  func.func @_fused_gat_kernel(%arg0: i32, %arg1: memref<1x128x128xbf16, #tpu.memory_space<vmem>>, %arg2: memref<1x128x128xbf16, #tpu.memory_space<vmem>>, %arg3: memref<128x128xbf16, #tpu.memory_space<vmem>>, %arg4: memref<128x128xbf16, #tpu.memory_space<vmem>>, %arg5: memref<1x128xf32, #tpu.memory_space<vmem>>, %arg6: memref<128x128xbf16, #tpu.memory_space<vmem>>, %arg7: memref<128x128xbf16, #tpu.memory_space<vmem>>, %arg8: memref<1x128xf32, #tpu.memory_space<vmem>>, %arg9: memref<128x128xbf16, #tpu.memory_space<vmem>>, %arg10: memref<128x128xbf16, #tpu.memory_space<vmem>>, %arg11: memref<1x128xf32, #tpu.memory_space<vmem>>, %arg12: memref<1x128x128xf32, #tpu.memory_space<vmem>>) attributes {dimension_semantics = [#tpu.dimension_semantics<parallel>], iteration_bounds = array<i64: 4>, scalar_prefetch = 0 : i64, scratch_operands = 0 : i64, tpu.core_type = #tpu.core_type<tc>, window_params = [{transform_indices = @transform_0, window_bounds = array<i64: 1, 128, 128>}, {transform_indices = @transform_1, window_bounds = array<i64: 1, 128, 128>}, {pipeline_mode = #tpu.pipeline_mode<synchronous>, transform_indices = @transform_2, window_bounds = array<i64: 128, 128>}, {pipeline_mode = #tpu.pipeline_mode<synchronous>, transform_indices = @transform_3, window_bounds = array<i64: 128, 128>}, {pipeline_mode = #tpu.pipeline_mode<synchronous>, transform_indices = @transform_4, window_bounds = array<i64: 1, 128>}, {pipeline_mode = #tpu.pipeline_mode<synchronous>, transform_indices = @transform_5, window_bounds = array<i64: 128, 128>}, {pipeline_mode = #tpu.pipeline_mode<synchronous>, transform_indices = @transform_6, window_bounds = array<i64: 128, 128>}, {pipeline_mode = #tpu.pipeline_mode<synchronous>, transform_indices = @transform_7, window_bounds = array<i64: 1, 128>}, {pipeline_mode = #tpu.pipeline_mode<synchronous>, transform_indices = @transform_8, window_bounds = array<i64: 128, 128>}, {pipeline_mode = #tpu.pipeline_mode<synchronous>, transform_indices = @transform_9, window_bounds = array<i64: 128, 128>}, {pipeline_mode = #tpu.pipeline_mode<synchronous>, transform_indices = @transform_10, window_bounds = array<i64: 1, 128>}, {transform_indices = @transform_11, window_bounds = array<i64: 1, 128, 128>}]} {
    %c0 = arith.constant 0 : index
    %c0_0 = arith.constant 0 : index
    %c0_1 = arith.constant 0 : index
    %0 = vector.load %arg2[%c0, %c0_0, %c0_1] : memref<1x128x128xbf16, #tpu.memory_space<vmem>>, vector<1x128x128xbf16>
    %1 = vector.shape_cast %0 : vector<1x128x128xbf16> to vector<128x128xbf16>
    %2 = arith.extf %1 : vector<128x128xbf16> to vector<128x128xf32>
    %c0_2 = arith.constant 0 : index
    %c0_3 = arith.constant 0 : index
    %c0_4 = arith.constant 0 : index
    %3 = vector.load %arg1[%c0_2, %c0_3, %c0_4] : memref<1x128x128xbf16, #tpu.memory_space<vmem>>, vector<1x128x128xbf16>
    %4 = vector.shape_cast %3 : vector<1x128x128xbf16> to vector<128x128xbf16>
    %c0_5 = arith.constant 0 : index
    %c0_6 = arith.constant 0 : index
    %5 = vector.load %arg3[%c0_5, %c0_6] : memref<128x128xbf16, #tpu.memory_space<vmem>>, vector<128x128xbf16>
    %cst = arith.constant dense<0.000000e+00> : vector<128x128xf32>
    %6 = tpu.matmul %4, %5, %cst {dimension_numbers = #tpu.dot_dimension_numbers<[1], [0], [0], [1], [0, 0, 1, 1], [], []>} : vector<128x128xbf16>, vector<128x128xbf16>, vector<128x128xf32> -> vector<128x128xf32>
    %7 = arith.truncf %6 : vector<128x128xf32> to vector<128x128xbf16>
    %c0_7 = arith.constant 0 : index
    %c0_8 = arith.constant 0 : index
    %8 = vector.load %arg4[%c0_7, %c0_8] : memref<128x128xbf16, #tpu.memory_space<vmem>>, vector<128x128xbf16>
    %cst_9 = arith.constant dense<0.000000e+00> : vector<128x128xf32>
    %9 = tpu.matmul %7, %8, %cst_9 {dimension_numbers = #tpu.dot_dimension_numbers<[1], [0], [0], [1], [0, 0, 1, 1], [], []>} : vector<128x128xbf16>, vector<128x128xbf16>, vector<128x128xf32> -> vector<128x128xf32>
    %10 = vector.extract_strided_slice %9 {offsets = [0, 0], sizes = [128, 1], strides = [1, 1]} : vector<128x128xf32> to vector<128x1xf32>
    %11 = tpu.transpose %9, [1, 0] : vector<128x128xf32> -> vector<128x128xf32>
    %12 = vector.extract_strided_slice %11 {offsets = [1, 0], sizes = [1, 128], strides = [1, 1]} : vector<128x128xf32> to vector<1x128xf32>
    %13 = vector.broadcast %10 : vector<128x1xf32> to vector<128x128xf32>
    %14 = vector.broadcast %12 : vector<1x128xf32> to vector<128x128xf32>
    %15 = arith.addf %13, %14 : vector<128x128xf32>
    %cst_10 = arith.constant 2.000000e-01 : f32
    %16 = vector.broadcast %cst_10 : f32 to vector<128x128xf32>
    %17 = arith.mulf %16, %15 : vector<128x128xf32>
    %18 = arith.maximumf %15, %17 : vector<128x128xf32>
    %19 = arith.addf %18, %2 : vector<128x128xf32>
    %cst_11 = arith.constant dense<0xFF800000> : vector<128xf32>
    %20 = vector.multi_reduction <maximumf>, %19, %cst_11 [1] : vector<128x128xf32> to vector<128xf32>
    %21 = vector.shape_cast %20 : vector<128xf32> to vector<128x1xf32>
    %22 = vector.broadcast %21 : vector<128x1xf32> to vector<128x128xf32>
    %23 = arith.subf %19, %22 : vector<128x128xf32>
    %24 = math.exp %23 : vector<128x128xf32>
    %cst_12 = arith.constant dense<0.000000e+00> : vector<128xf32>
    %25 = vector.multi_reduction <add>, %24, %cst_12 [1] : vector<128x128xf32> to vector<128xf32>
    %26 = vector.shape_cast %25 : vector<128xf32> to vector<128x1xf32>
    %27 = arith.truncf %24 : vector<128x128xf32> to vector<128x128xbf16>
    %cst_13 = arith.constant dense<0.000000e+00> : vector<128x128xf32>
    %28 = tpu.matmul %27, %7, %cst_13 {dimension_numbers = #tpu.dot_dimension_numbers<[1], [0], [0], [1], [0, 0, 1, 1], [], []>} : vector<128x128xbf16>, vector<128x128xbf16>, vector<128x128xf32> -> vector<128x128xf32>
    %29 = tpu.reciprocal %26 {approx = true} : vector<128x1xf32> -> vector<128x1xf32>
    %30 = vector.broadcast %29 : vector<128x1xf32> to vector<128x128xf32>
    %31 = arith.mulf %28, %30 : vector<128x128xf32>
    %c0_14 = arith.constant 0 : index
    %c0_15 = arith.constant 0 : index
    %32 = vector.load %arg5[%c0_14, %c0_15] : memref<1x128xf32, #tpu.memory_space<vmem>>, vector<1x128xf32>
    %33 = vector.broadcast %32 : vector<1x128xf32> to vector<128x128xf32>
    %34 = arith.addf %31, %33 : vector<128x128xf32>
    %cst_16 = arith.constant 0.000000e+00 : f32
    %35 = vector.broadcast %cst_16 : f32 to vector<128x128xf32>
    %36 = arith.maximumf %34, %35 : vector<128x128xf32>
    %37 = arith.truncf %36 : vector<128x128xf32> to vector<128x128xbf16>
    %c0_17 = arith.constant 0 : index
    %c0_18 = arith.constant 0 : index
    %38 = vector.load %arg6[%c0_17, %c0_18] : memref<128x128xbf16, #tpu.memory_space<vmem>>, vector<128x128xbf16>
    %cst_19 = arith.constant dense<0.000000e+00> : vector<128x128xf32>
    %39 = tpu.matmul %37, %38, %cst_19 {dimension_numbers = #tpu.dot_dimension_numbers<[1], [0], [0], [1], [0, 0, 1, 1], [], []>} : vector<128x128xbf16>, vector<128x128xbf16>, vector<128x128xf32> -> vector<128x128xf32>
    %40 = arith.truncf %39 : vector<128x128xf32> to vector<128x128xbf16>
    %c0_20 = arith.constant 0 : index
    %c0_21 = arith.constant 0 : index
    %41 = vector.load %arg7[%c0_20, %c0_21] : memref<128x128xbf16, #tpu.memory_space<vmem>>, vector<128x128xbf16>
    %cst_22 = arith.constant dense<0.000000e+00> : vector<128x128xf32>
    %42 = tpu.matmul %40, %41, %cst_22 {dimension_numbers = #tpu.dot_dimension_numbers<[1], [0], [0], [1], [0, 0, 1, 1], [], []>} : vector<128x128xbf16>, vector<128x128xbf16>, vector<128x128xf32> -> vector<128x128xf32>
    %43 = vector.extract_strided_slice %42 {offsets = [0, 0], sizes = [128, 1], strides = [1, 1]} : vector<128x128xf32> to vector<128x1xf32>
    %44 = tpu.transpose %42, [1, 0] : vector<128x128xf32> -> vector<128x128xf32>
    %45 = vector.extract_strided_slice %44 {offsets = [1, 0], sizes = [1, 128], strides = [1, 1]} : vector<128x128xf32> to vector<1x128xf32>
    %46 = vector.broadcast %43 : vector<128x1xf32> to vector<128x128xf32>
    %47 = vector.broadcast %45 : vector<1x128xf32> to vector<128x128xf32>
    %48 = arith.addf %46, %47 : vector<128x128xf32>
    %cst_23 = arith.constant 2.000000e-01 : f32
    %49 = vector.broadcast %cst_23 : f32 to vector<128x128xf32>
    %50 = arith.mulf %49, %48 : vector<128x128xf32>
    %51 = arith.maximumf %48, %50 : vector<128x128xf32>
    %52 = arith.addf %51, %2 : vector<128x128xf32>
    %cst_24 = arith.constant dense<0xFF800000> : vector<128xf32>
    %53 = vector.multi_reduction <maximumf>, %52, %cst_24 [1] : vector<128x128xf32> to vector<128xf32>
    %54 = vector.shape_cast %53 : vector<128xf32> to vector<128x1xf32>
    %55 = vector.broadcast %54 : vector<128x1xf32> to vector<128x128xf32>
    %56 = arith.subf %52, %55 : vector<128x128xf32>
    %57 = math.exp %56 : vector<128x128xf32>
    %cst_25 = arith.constant dense<0.000000e+00> : vector<128xf32>
    %58 = vector.multi_reduction <add>, %57, %cst_25 [1] : vector<128x128xf32> to vector<128xf32>
    %59 = vector.shape_cast %58 : vector<128xf32> to vector<128x1xf32>
    %60 = arith.truncf %57 : vector<128x128xf32> to vector<128x128xbf16>
    %cst_26 = arith.constant dense<0.000000e+00> : vector<128x128xf32>
    %61 = tpu.matmul %60, %40, %cst_26 {dimension_numbers = #tpu.dot_dimension_numbers<[1], [0], [0], [1], [0, 0, 1, 1], [], []>} : vector<128x128xbf16>, vector<128x128xbf16>, vector<128x128xf32> -> vector<128x128xf32>
    %62 = tpu.reciprocal %59 {approx = true} : vector<128x1xf32> -> vector<128x1xf32>
    %63 = vector.broadcast %62 : vector<128x1xf32> to vector<128x128xf32>
    %64 = arith.mulf %61, %63 : vector<128x128xf32>
    %c0_27 = arith.constant 0 : index
    %c0_28 = arith.constant 0 : index
    %65 = vector.load %arg8[%c0_27, %c0_28] : memref<1x128xf32, #tpu.memory_space<vmem>>, vector<1x128xf32>
    %66 = vector.broadcast %65 : vector<1x128xf32> to vector<128x128xf32>
    %67 = arith.addf %64, %66 : vector<128x128xf32>
    %cst_29 = arith.constant 0.000000e+00 : f32
    %68 = vector.broadcast %cst_29 : f32 to vector<128x128xf32>
    %69 = arith.maximumf %67, %68 : vector<128x128xf32>
    %70 = arith.truncf %69 : vector<128x128xf32> to vector<128x128xbf16>
    %c0_30 = arith.constant 0 : index
    %c0_31 = arith.constant 0 : index
    %71 = vector.load %arg9[%c0_30, %c0_31] : memref<128x128xbf16, #tpu.memory_space<vmem>>, vector<128x128xbf16>
    %cst_32 = arith.constant dense<0.000000e+00> : vector<128x128xf32>
    %72 = tpu.matmul %70, %71, %cst_32 {dimension_numbers = #tpu.dot_dimension_numbers<[1], [0], [0], [1], [0, 0, 1, 1], [], []>} : vector<128x128xbf16>, vector<128x128xbf16>, vector<128x128xf32> -> vector<128x128xf32>
    %73 = arith.truncf %72 : vector<128x128xf32> to vector<128x128xbf16>
    %c0_33 = arith.constant 0 : index
    %c0_34 = arith.constant 0 : index
    %74 = vector.load %arg10[%c0_33, %c0_34] : memref<128x128xbf16, #tpu.memory_space<vmem>>, vector<128x128xbf16>
    %cst_35 = arith.constant dense<0.000000e+00> : vector<128x128xf32>
    %75 = tpu.matmul %73, %74, %cst_35 {dimension_numbers = #tpu.dot_dimension_numbers<[1], [0], [0], [1], [0, 0, 1, 1], [], []>} : vector<128x128xbf16>, vector<128x128xbf16>, vector<128x128xf32> -> vector<128x128xf32>
    %76 = vector.extract_strided_slice %75 {offsets = [0, 0], sizes = [128, 1], strides = [1, 1]} : vector<128x128xf32> to vector<128x1xf32>
    %77 = tpu.transpose %75, [1, 0] : vector<128x128xf32> -> vector<128x128xf32>
    %78 = vector.extract_strided_slice %77 {offsets = [1, 0], sizes = [1, 128], strides = [1, 1]} : vector<128x128xf32> to vector<1x128xf32>
    %79 = vector.broadcast %76 : vector<128x1xf32> to vector<128x128xf32>
    %80 = vector.broadcast %78 : vector<1x128xf32> to vector<128x128xf32>
    %81 = arith.addf %79, %80 : vector<128x128xf32>
    %cst_36 = arith.constant 2.000000e-01 : f32
    %82 = vector.broadcast %cst_36 : f32 to vector<128x128xf32>
    %83 = arith.mulf %82, %81 : vector<128x128xf32>
    %84 = arith.maximumf %81, %83 : vector<128x128xf32>
    %85 = arith.addf %84, %2 : vector<128x128xf32>
    %cst_37 = arith.constant dense<0xFF800000> : vector<128xf32>
    %86 = vector.multi_reduction <maximumf>, %85, %cst_37 [1] : vector<128x128xf32> to vector<128xf32>
    %87 = vector.shape_cast %86 : vector<128xf32> to vector<128x1xf32>
    %88 = vector.broadcast %87 : vector<128x1xf32> to vector<128x128xf32>
    %89 = arith.subf %85, %88 : vector<128x128xf32>
    %90 = math.exp %89 : vector<128x128xf32>
    %cst_38 = arith.constant dense<0.000000e+00> : vector<128xf32>
    %91 = vector.multi_reduction <add>, %90, %cst_38 [1] : vector<128x128xf32> to vector<128xf32>
    %92 = vector.shape_cast %91 : vector<128xf32> to vector<128x1xf32>
    %93 = arith.truncf %90 : vector<128x128xf32> to vector<128x128xbf16>
    %cst_39 = arith.constant dense<0.000000e+00> : vector<128x128xf32>
    %94 = tpu.matmul %93, %73, %cst_39 {dimension_numbers = #tpu.dot_dimension_numbers<[1], [0], [0], [1], [0, 0, 1, 1], [], []>} : vector<128x128xbf16>, vector<128x128xbf16>, vector<128x128xf32> -> vector<128x128xf32>
    %95 = tpu.reciprocal %92 {approx = true} : vector<128x1xf32> -> vector<128x1xf32>
    %96 = vector.broadcast %95 : vector<128x1xf32> to vector<128x128xf32>
    %97 = arith.mulf %94, %96 : vector<128x128xf32>
    %c0_40 = arith.constant 0 : index
    %c0_41 = arith.constant 0 : index
    %98 = vector.load %arg11[%c0_40, %c0_41] : memref<1x128xf32, #tpu.memory_space<vmem>>, vector<1x128xf32>
    %99 = vector.broadcast %98 : vector<1x128xf32> to vector<128x128xf32>
    %100 = arith.addf %97, %99 : vector<128x128xf32>
    %c0_42 = arith.constant 0 : index
    %c0_43 = arith.constant 0 : index
    %c0_44 = arith.constant 0 : index
    %101 = vector.load %arg12[%c0_42, %c0_43, %c0_44] : memref<1x128x128xf32, #tpu.memory_space<vmem>>, vector<1x128x128xf32>
    %102 = vector.shape_cast %101 : vector<1x128x128xf32> to vector<128x128xf32>
    %103 = vector.shape_cast %100 : vector<128x128xf32> to vector<1x128x128xf32>
    tpu.vector_store %arg12[%c0_42, %c0_43, %c0_44], %103 {strides = array<i32>} : memref<1x128x128xf32, #tpu.memory_space<vmem>>, vector<1x128x128xf32>,
    return
  }
  func.func @transform_0(%arg0: i32) -> (i32, i32, i32) {
    %c0_i32 = arith.constant 0 : i32
    %c0_i32_0 = arith.constant 0 : i32
    %c0_i32_1 = arith.constant 0 : i32
    return %arg0, %c0_i32, %c0_i32_0 : i32, i32, i32
  }
  func.func @transform_1(%arg0: i32) -> (i32, i32, i32) {
    %c0_i32 = arith.constant 0 : i32
    %c0_i32_0 = arith.constant 0 : i32
    %c0_i32_1 = arith.constant 0 : i32
    return %arg0, %c0_i32, %c0_i32_0 : i32, i32, i32
  }
  func.func @transform_2(%arg0: i32) -> (i32, i32) {
    %c0_i32 = arith.constant 0 : i32
    %c0_i32_0 = arith.constant 0 : i32
    %c0_i32_1 = arith.constant 0 : i32
    return %c0_i32, %c0_i32_0 : i32, i32
  }
  func.func @transform_3(%arg0: i32) -> (i32, i32) {
    %c0_i32 = arith.constant 0 : i32
    %c0_i32_0 = arith.constant 0 : i32
    %c0_i32_1 = arith.constant 0 : i32
    return %c0_i32, %c0_i32_0 : i32, i32
  }
  func.func @transform_4(%arg0: i32) -> (i32, i32) {
    %c0_i32 = arith.constant 0 : i32
    %c0_i32_0 = arith.constant 0 : i32
    %c0_i32_1 = arith.constant 0 : i32
    return %c0_i32, %c0_i32_0 : i32, i32
  }
  func.func @transform_5(%arg0: i32) -> (i32, i32) {
    %c0_i32 = arith.constant 0 : i32
    %c0_i32_0 = arith.constant 0 : i32
    %c0_i32_1 = arith.constant 0 : i32
    return %c0_i32, %c0_i32_0 : i32, i32
  }
  func.func @transform_6(%arg0: i32) -> (i32, i32) {
    %c0_i32 = arith.constant 0 : i32
    %c0_i32_0 = arith.constant 0 : i32
    %c0_i32_1 = arith.constant 0 : i32
    return %c0_i32, %c0_i32_0 : i32, i32
  }
  func.func @transform_7(%arg0: i32) -> (i32, i32) {
    %c0_i32 = arith.constant 0 : i32
    %c0_i32_0 = arith.constant 0 : i32
    %c0_i32_1 = arith.constant 0 : i32
    return %c0_i32, %c0_i32_0 : i32, i32
  }
  func.func @transform_8(%arg0: i32) -> (i32, i32) {
    %c0_i32 = arith.constant 0 : i32
    %c0_i32_0 = arith.constant 0 : i32
    %c0_i32_1 = arith.constant 0 : i32
    return %c0_i32, %c0_i32_0 : i32, i32
  }
  func.func @transform_9(%arg0: i32) -> (i32, i32) {
    %c0_i32 = arith.constant 0 : i32
    %c0_i32_0 = arith.constant 0 : i32
    %c0_i32_1 = arith.constant 0 : i32
    return %c0_i32, %c0_i32_0 : i32, i32
  }
  func.func @transform_10(%arg0: i32) -> (i32, i32) {
    %c0_i32 = arith.constant 0 : i32
    %c0_i32_0 = arith.constant 0 : i32
    %c0_i32_1 = arith.constant 0 : i32
    return %c0_i32, %c0_i32_0 : i32, i32
  }
  func.func @transform_11(%arg0: i32) -> (i32, i32, i32) {
    %c0_i32 = arith.constant 0 : i32
    %c0_i32_0 = arith.constant 0 : i32
    %c0_i32_1 = arith.constant 0 : i32
    return %arg0, %c0_i32, %c0_i32_0 : i32, i32, i32
  }
}

</mosaic_0001>

<bundles_post_ra>
// kernel: tpu_custom_call.1
= control target key start
LH: loop header
LB: loop body
LE: loop exit
PB: predicated region body
PF: predicated region fallthrough
CT: control target
= control target key end

     0   :  { %s5418_s0 = inlined_call_operand.hbm [shape: bf16[4,128,128], index: 0, kind: input, shape index: {}]   ;;  %s5419_s1 = inlined_call_operand.hbm [shape: bf16[4,128,128], index: 1, kind: input, shape index: {}]   ;;  %s5420_s2 = inlined_call_operand.hbm [shape: bf16[128,128], index: 2, kind: input, shape index: {}]   ;;  %s5421_s3 = inlined_call_operand.hbm [shape: bf16[128,128], index: 3, kind: input, shape index: {}]   ;;  %s5422_s4 = inlined_call_operand.vmem [shape: f32[1,128], index: 4, kind: input, shape index: {}]   ;;  %s5423_s5 = inlined_call_operand.hbm [shape: bf16[128,128], index: 5, kind: input, shape index: {}]   ;;  %s5424_s6 = inlined_call_operand.hbm [shape: bf16[128,128], index: 6, kind: input, shape index: {}]   ;;  %s5425_s7 = inlined_call_operand.vmem [shape: f32[1,128], index: 7, kind: input, shape index: {}]   ;;  %s5426_s8 = inlined_call_operand.hbm [shape: bf16[128,128], index: 8, kind: input, shape index: {}]   ;;  %s5427_s9 = inlined_call_operand.hbm [shape: bf16[128,128], index: 9, kind: input, shape index: {}]   ;;  %s5428_s10 = inlined_call_operand.vmem [shape: f32[1,128], index: 10, kind: input, shape index: {}]   ;;  %s5429_s11 = inlined_call_operand.hbm [shape: f32[4,128,128], index: 11, kind: output, shape index: {}]  }
   0x1   :  { %5438 = sst [smem:[#allocation24_spill]] %s5418_s0 }
   0x2   :  { %5439 = sst [smem:[#allocation25_spill]] %s5420_s2 }
   0x3   :  { %5440 = sst [smem:[#allocation26_spill]] %s5421_s3 }
   0x4   :  { %5441 = sst [smem:[#allocation27_spill]] %s5423_s5 }
   0x5   :  { %5442 = sst [smem:[#allocation28_spill]] %s5424_s6 }
   0x6   :  { %5443 = sst [smem:[#allocation29_spill]] %s5425_s7 }
   0x7   :  { %5444 = sst [smem:[#allocation30_spill]] %s5428_s10 }
   0x8   :  { %5445 = sst [smem:[#allocation31_spill]] %s5429_s11 }
   0x9   :  { %16 = vsyncpa [#allocation3], 0 }
   0xa   :  { %18 = vsyncpa [#allocation3 + $0x1], 0 }
   0xb   :  { %19 = vsyncpa [#allocation6], 0 }
   0xc   :  { %21 = vsyncpa [#allocation6 + $0x1], 0 }
   0xd   :  { %22 = vsyncpa [#allocation9], 0 }
   0xe   :  { %23 = vsyncpa [#allocation12], 0 }
   0xf   :  { %24 = vsyncpa [#allocation15], 0 }
  0x10   :  { %25 = vsyncpa [#allocation4], 0 }
  0x11   :  { %27 = vsyncpa [#allocation4 + $0x1], 0  ;;  %s4542_s17 = smov 0   ;;  %s4544_s18 = smov 0  }
  0x12   :  { %s4546_s19 = smov 0   ;;  %s4548_s20 = smov 0  }
  0x13 LB: > { %s4468_s21 = smov [#allocation7]   ;;  %s4563_s23 = sadd.s32 4294967295, %s4466_s20   ;;  %s4466_s20 = sphi %s4548_s20, %s5479_s20   ;;  %s4462_s19 = sphi %s4546_s19, %s5478_s19   ;;  %s4458_s18 = sphi %s4544_s18, %s5477_s18   ;;  %s4454_s17 = sphi %s4542_s17, %s5476_s17  }
  0x14   : > { %s317_s22 = sshll.u32 %s4468_s21, 4  ;;  %p3207_p0 = scmp.ge.s32.totalorder %s4466_s20, 1  ;;  %s4568_s22 = int_to_ptr.vmem [resolvable:$true] %s317_s22 }
  0x15   : > { %p5431_p1 = scmp.eq.s32.totalorder %s4563_s23, 0  ;;  %p305_p2 = scmp.lt.s32.totalorder %s4466_s20, 5 }
  0x16   : > { %s4469_s25 = smov [#allocation8]   ;;  %s4470_s28 = smov [#allocation11]  }
  0x17   : > { %p4570_p3 = pnand %p3207_p0, %p305_p2  ;;  %s330_s26 = sshll.u32 %s4469_s25, 4  ;;  %s4582_s26 = int_to_ptr.vmem [resolvable:$true] %s330_s26 }
  0x18   : > { %s359_s29 = sshll.u32 %s4470_s28, 4  ;;  %s5448_s2 = sld [smem:[#allocation25_spill]]  ;;  %s4584_s29 = int_to_ptr.vmem [resolvable:$true] %s359_s29 }
  0x19   : > { %s5446_s24 = scalar_select %p4570_p3, 1, 0 }
  0x1a   : > { %p3815_p4 = pneg %p4570_p3 }
  0x1c   : > { %p4578_p5 = pnand %p3815_p4, %p5431_p1 }
  0x1e   : > { %s4152_s13 = scalar_lea.hbm %s5448_s2, 1024  ;;  %p4594_p7 = pneg %p4578_p5 }
  0x1f   : > { %p4153_p6 = scmp.ne.s32.totalorder %s5448_s2, %s4152_s13  ;;  %p4159_p10 = scmp.lt.u32.totalorder %s4152_s13, %s5448_s2 }
  0x21   : > { %p4155_p8 = pnand %p4594_p7, %p4153_p6 }
  0x23   : > { %p4156_p9 = pneg %p4155_p8 }
  0x25   : > { %p4161_p11 = pnand %p4159_p10, %p4156_p9 }
  0x27   : > { %4164 = shalt.err (!%p4161_p11)
}
  0x28   : > { %s4165_s28 = scalar_lea.vmem %s4568_s22, 1024  ;;  %p4173_p2 = scmp.lt.s32.totalorder %s4568_s22, %s4568_s22 }
  0x29   : > { %p4166_p12 = scmp.ne.s32.totalorder %s4568_s22, %s4165_s28  ;;  %p4174_p4 = scmp.lt.s32.totalorder %s4165_s28, %s4165_s28 }
  0x2b   : > { %p4168_p13 = pnand %p4166_p12, %p4594_p7  ;;  %p4175_p6 = por %p4174_p4, %p4173_p2 }
  0x2d   : > { %p4169_p0 = pneg %p4168_p13 }
  0x2f   : > { %p4176_p8 = pnand %p4175_p6, %p4169_p0 }
  0x31   : > { %4179 = shalt.err (!%p4176_p8)
}
  0x32   : > { %s5433_s30 = smov 64   ;;  %s5435_s12 = smov 4  }
  0x33   : > { %3818 = dma.hbm_to_vmem [thread:$0]  (!%p4578_p5), %s5448_s2, 1024, %s4568_s22, [#allocation6], %s5433_s30, %s5433_s30, %s5435_s12  }
  0x34   : > { %s5450_s3 = sld [smem:[#allocation26_spill]] }
  0x3a   : > { %s4180_s25 = scalar_lea.hbm %s5450_s3, 1024 }
  0x3b   : > { %p4181_p9 = scmp.ne.s32.totalorder %s5450_s3, %s4180_s25  ;;  %p4187_p12 = scmp.lt.u32.totalorder %s4180_s25, %s5450_s3 }
  0x3d   : > { %p4183_p10 = pnand %p4181_p9, %p4594_p7 }
  0x3f   : > { %p4184_p11 = pneg %p4183_p10 }
  0x41   : > { %p4189_p13 = pnand %p4187_p12, %p4184_p11 }
  0x43   : > { %4192 = shalt.err (!%p4189_p13)
}
  0x44   : > { %s4193_s22 = scalar_lea.vmem %s4582_s26, 1024  ;;  %p4201_p6 = scmp.lt.s32.totalorder %s4582_s26, %s4582_s26 }
  0x45   : > { %p4194_p0 = scmp.ne.s32.totalorder %s4582_s26, %s4193_s22  ;;  %p4202_p8 = scmp.lt.s32.totalorder %s4193_s22, %s4193_s22 }
  0x47   : > { %p4196_p2 = pnand %p4194_p0, %p4594_p7  ;;  %p4203_p9 = por %p4202_p8, %p4201_p6 }
  0x49   : > { %p4197_p4 = pneg %p4196_p2 }
  0x4b   : > { %p4204_p10 = pnand %p4203_p9, %p4197_p4 }
  0x4d   : > { %4207 = shalt.err (!%p4204_p10)
}
  0x4e   : > { %3821 = dma.hbm_to_vmem [thread:$0]  (!%p4578_p5), %s5450_s3, 1024, %s4582_s26, [#allocation9], %s5433_s30, %s5433_s30, %s5435_s12  }
  0x4f   : > { %s5451_s6 = sld [smem:[#allocation28_spill]] }
  0x55   : > { %s4208_s14 = scalar_lea.hbm %s5451_s6, 1024 }
  0x56   : > { %p4209_p11 = scmp.ne.s32.totalorder %s5451_s6, %s4208_s14  ;;  %p4215_p0 = scmp.lt.u32.totalorder %s4208_s14, %s5451_s6 }
  0x58   : > { %p4211_p12 = pnand %p4209_p11, %p4594_p7 }
  0x5a   : > { %p4212_p13 = pneg %p4211_p12 }
  0x5c   : > { %p4217_p2 = pnand %p4215_p0, %p4212_p13 }
  0x5e   : > { %4220 = shalt.err (!%p4217_p2)
}
  0x5f   : > { %s4221_s26 = scalar_lea.vmem %s4584_s29, 1024  ;;  %p4229_p9 = scmp.lt.s32.totalorder %s4584_s29, %s4584_s29 }
  0x60   : > { %p4222_p4 = scmp.ne.s32.totalorder %s4584_s29, %s4221_s26  ;;  %p4230_p10 = scmp.lt.s32.totalorder %s4221_s26, %s4221_s26 }
  0x62   : > { %p4224_p6 = pnand %p4222_p4, %p4594_p7  ;;  %p4231_p11 = por %p4230_p10, %p4229_p9 }
  0x64   : > { %p4225_p8 = pneg %p4224_p6 }
  0x66   : > { %p4232_p12 = pnand %p4231_p11, %p4225_p8 }
  0x68   : > { %4235 = shalt.err (!%p4232_p12)
}
  0x69   : > { %3827 = dma.hbm_to_vmem [thread:$0]  (!%p4578_p5), %s5451_s6, 1024, %s4584_s29, [#allocation12], %s5433_s30, %s5433_s30, %s5435_s12  }
  0x6a   : > { %s4473_s10 = smov [#allocation10]   ;;  %s4474_s13 = smov [#allocation13]  }
  0x6b   : > { %s346_s11 = sshll.u32 %s4473_s10, 4  ;;  %s375_s14 = sshll.u32 %s4474_s13, 4  ;;  %s347_s11 = int_to_ptr.vmem [resolvable:$true] %s346_s11  ;;  %s376_s14 = int_to_ptr.vmem [resolvable:$true] %s375_s14 }
  0x6c   : > { %s5452_s5 = sld [smem:[#allocation27_spill]] }
  0x72   : > { %s4236_s25 = scalar_lea.hbm %s5452_s5, 1024 }
  0x73   : > { %p4237_p13 = scmp.ne.s32.totalorder %s5452_s5, %s4236_s25  ;;  %p4243_p4 = scmp.lt.u32.totalorder %s4236_s25, %s5452_s5 }
  0x75   : > { %p4239_p0 = pnand %p4237_p13, %p4594_p7 }
  0x77   : > { %p4240_p2 = pneg %p4239_p0 }
  0x79   : > { %p4245_p6 = pnand %p4243_p4, %p4240_p2 }
  0x7b   : > { %4248 = shalt.err (!%p4245_p6)
}
  0x7c   : > { %s4249_s29 = scalar_lea.vmem %s347_s11, 1024  ;;  %p4257_p11 = scmp.lt.s32.totalorder %s347_s11, %s347_s11 }
  0x7d   : > { %p4250_p8 = scmp.ne.s32.totalorder %s347_s11, %s4249_s29  ;;  %p4258_p12 = scmp.lt.s32.totalorder %s4249_s29, %s4249_s29 }
  0x7f   : > { %p4252_p9 = pnand %p4250_p8, %p4594_p7  ;;  %p4259_p1 = por %p4258_p12, %p4257_p11 }
  0x81   : > { %p4253_p10 = pneg %p4252_p9 }
  0x83   : > { %p4260_p3 = pnand %p4259_p1, %p4253_p10 }
  0x85   : > { %4263 = shalt.err (!%p4260_p3)
}
  0x86   : > { %3824 = dma.hbm_to_vmem [thread:$0]  (!%p4578_p5), %s5452_s5, 1024, %s347_s11, [#allocation9], %s5433_s30, %s5433_s30, %s5435_s12  }
  0x87   : > { %s4264_s15 = scalar_lea.hbm %s5426_s8, 1024 }
  0x88   : > { %p4265_p1 = scmp.ne.s32.totalorder %s5426_s8, %s4264_s15  ;;  %p4271_p0 = scmp.lt.u32.totalorder %s4264_s15, %s5426_s8 }
  0x8a   : > { %p4267_p3 = pnand %p4265_p1, %p4594_p7 }
  0x8c   : > { %p4268_p13 = pneg %p4267_p3 }
  0x8e   : > { %p4273_p2 = pnand %p4271_p0, %p4268_p13 }
  0x90   : > { %4276 = shalt.err (!%p4273_p2)
}
  0x91   : > { %s4277_s22 = scalar_lea.vmem %s376_s14, 1024  ;;  %p4285_p9 = scmp.lt.s32.totalorder %s376_s14, %s376_s14 }
  0x92   : > { %p4278_p4 = scmp.ne.s32.totalorder %s376_s14, %s4277_s22  ;;  %p4286_p10 = scmp.lt.s32.totalorder %s4277_s22, %s4277_s22 }
  0x94   : > { %p4280_p6 = pnand %p4278_p4, %p4594_p7  ;;  %p4287_p11 = por %p4286_p10, %p4285_p9 }
  0x96   : > { %p4281_p8 = pneg %p4280_p6 }
  0x98   : > { %p4288_p12 = pnand %p4287_p11, %p4281_p8 }
  0x9a   : > { %4291 = shalt.err (!%p4288_p12)
}
  0x9b   : > { %3830 = dma.hbm_to_vmem [thread:$0]  (!%p4578_p5), %s5426_s8, 1024, %s376_s14, [#allocation12], %s5433_s30, %s5433_s30, %s5435_s12  }
  0x9c   : > { %s4475_s2 = smov [#allocation14]   ;;  %s4292_s15 = scalar_lea.hbm %s5427_s9, 1024 }
  0x9d   : > { %s388_s7 = sshll.u32 %s4475_s2, 4  ;;  %p4293_p1 = scmp.ne.s32.totalorder %s5427_s9, %s4292_s15  ;;  %s389_s7 = int_to_ptr.vmem [resolvable:$true] %s388_s7 }
  0x9e   : > { %p4299_p0 = scmp.lt.u32.totalorder %s4292_s15, %s5427_s9 }
  0x9f   : > { %p4295_p3 = pnand %p4293_p1, %p4594_p7 }
  0xa1   : > { %p4296_p13 = pneg %p4295_p3 }
  0xa3   : > { %p4301_p2 = pnand %p4299_p0, %p4296_p13 }
  0xa5   : > { %4304 = shalt.err (!%p4301_p2)
}
  0xa6   : > { %s4305_s14 = scalar_lea.vmem %s389_s7, 1024  ;;  %p4313_p9 = scmp.lt.s32.totalorder %s389_s7, %s389_s7 }
  0xa7   : > { %p4306_p4 = scmp.ne.s32.totalorder %s389_s7, %s4305_s14  ;;  %p4314_p10 = scmp.lt.s32.totalorder %s4305_s14, %s4305_s14 }
  0xa9   : > { %p4308_p6 = pnand %p4306_p4, %p4594_p7  ;;  %p4315_p11 = por %p4314_p10, %p4313_p9 }
  0xab   : > { %p4309_p8 = pneg %p4308_p6 }
  0xad   : > { %p4316_p12 = pnand %p4315_p11, %p4309_p8 }
  0xaf   : > { %4319 = shalt.err (!%p4316_p12)
}
  0xb0   : > { %3833 = dma.hbm_to_vmem [thread:$0]  (!%p4578_p5), %s5427_s9, 1024, %s389_s7, [#allocation15], %s5433_s30, %s5433_s30, %s5435_s12  }
  0xb1   : > { %s3206_s27 = sadd.s32 4294967294, %s4466_s20   ;;  %s4735_s16 = sadd.s32 1, %s4466_s20  }
  0xb2   : > { %s37_s29 = ssub.s32 %s4466_s20, %s4735_s16  ;;  %s40_s2 = sadd.s32 1, %s4462_s19 }
  0xb3   : > { %p38_p7 = scmp.eq.s32.totalorder %s37_s29, 0  ;;  %p47_p1 = scmp.ne.s32.totalorder %s4462_s19, %s4458_s18 }
  0xb4   : > { %p48_p3 = scmp.eq.s32.totalorder %s4466_s20, 0  ;;  %p53_p13 = scmp.ne.s32.totalorder %s4458_s18, %s4454_s17 }
  0xb5   : > { %s4746_s10 = scalar_select %p38_p7, %s4462_s19, %s40_s2  }
  0xb6   : > { %p4748_p0 = por %p48_p3, %p47_p1  ;;  %p5454_p2 = scmp.eq.s32.totalorder %s4563_s23, 0 }
  0xb7   : > { %p292_p4 = scmp.eq.s32.totalorder %s4563_s23, 3  ;;  %p298_p6 = scmp.eq.s32.totalorder %s3206_s27, 3 }
  0xb8   : > { %p4754_p5 = por %p5454_p2, %p53_p13  ;;  %p3851_p8 = scmp.lt.s32.totalorder %s4466_s20, 4 }
  0xb9   : > { %s405_s15 = sand.u32 1, %s4462_s19   ;;  %p4761_p9 = por %p292_p4, %p47_p1 }
  0xba   : > { %p4765_p10 = por %p298_p6, %p53_p13  ;;  %s3215_s28 = sshll.u32 %s405_s15, 6 }
  0xbb   : > { %s5456_s21 = scalar_select %p4761_p9, 1, 0 }
  0xbc   : > { %s5457_s25 = scalar_select %p4765_p10, 1, 0 }
  0xbd   : > { %s3295_s26 = sshll.u32 %s4466_s20, 10  ;;  %s5458_s0 = sld [smem:[#allocation24_spill]] }
  0xbe   : > { %s409_s27 = scalar_lea.vmem [#allocation2], %s3215_s28  ;;  %p4779_p11 = pnand %p3851_p8, %p4748_p0 }
  0xbf   : > { %s416_s29 = sshll.u32 %s409_s27, 4  ;;  %s4786_s14 = scalar_lea.hbm %s5419_s1, %s3295_s26  ;;  %s4775_s29 = int_to_ptr.vmem [resolvable:$true] %s416_s29 }
  0xc0   : > { %s430_s22 = scalar_lea.vmem [#allocation5], %s3215_s28  ;;  %s4790_s5 = scalar_lea.sflag [#allocation3], %s405_s15 }
  0xc1   : > { %s4788_s3 = sshll.u32 %s430_s22, 4  ;;  %p4322_p7 = pneg %p4779_p11  ;;  %s4822_s3 = int_to_ptr.vmem [resolvable:$true] %s4788_s3 }
  0xc3   : > { %s4773_s11 = scalar_lea.hbm %s5458_s0, %s3295_s26  ;;  %s4325_s30 = scalar_lea.hbm %s5458_s0, 4096 }
  0xc4   : > { %s4320_s27 = scalar_lea.hbm %s4773_s11, 1024  ;;  %p4326_p13 = scmp.lt.u32.totalorder %s4773_s11, %s5458_s0 }
  0xc5   : > { %p4321_p12 = scmp.ne.s32.totalorder %s4773_s11, %s4320_s27  ;;  %p4327_p0 = scmp.lt.u32.totalorder %s4325_s30, %s4320_s27 }
  0xc6   : > { %p4329_p4 = scmp.lt.u32.totalorder %s4320_s27, %s4773_s11 }
  0xc7   : > { %p4323_p1 = pnand %p4322_p7, %p4321_p12  ;;  %p4328_p2 = por %p4327_p0, %p4326_p13 }
  0xc9   : > { %p4324_p3 = pneg %p4323_p1  ;;  %p4330_p6 = por %p4329_p4, %p4328_p2 }
  0xcb   : > { %p4331_p8 = pnand %p4330_p6, %p4324_p3 }
  0xcd   : > { %4334 = shalt.err (!%p4331_p8)
}
  0xce   : > { %s4335_s15 = scalar_lea.vmem %s4775_s29, 1024  ;;  %s4476_s6 = smov [#allocation2]  }
  0xcf   : > { %p4336_p12 = scmp.ne.s32.totalorder %s4775_s29, %s4335_s15  ;;  %s4340_s28 = sshll.u32 %s4476_s6, 4  ;;  %s4341_s28 = int_to_ptr.vmem [resolvable:$false] %s4340_s28 }
  0xd0   : > { %s4342_s22 = scalar_lea.vmem %s4341_s28, 2048  ;;  %p4343_p9 = scmp.lt.s32.totalorder %s4775_s29, %s4341_s28 }
  0xd1   : > { %p4338_p1 = pnand %p4336_p12, %p4322_p7  ;;  %p4344_p13 = scmp.lt.s32.totalorder %s4342_s22, %s4335_s15 }
  0xd3   : > { %p4339_p10 = pneg %p4338_p1  ;;  %p4345_p0 = por %p4344_p13, %p4343_p9 }
  0xd5   : > { %p4346_p2 = pnand %p4345_p0, %p4339_p10 }
  0xd7   : > { %4349 = shalt.err (!%p4346_p2)
}
  0xd8   : > { %s5460_s27 = smov 4   ;;  %s5461_s13 = smov 64  }
  0xd9   : > { %3837 = dma.hbm_to_vmem [thread:$0]  (!%p4779_p11), %s4773_s11, 1024, %s4775_s29, %s4790_s5, %s5461_s13, %s5461_s13, %s5460_s27  }
  0xda   : > { %s426_s30 = sand.u32 1, %s4466_s20   ;;  %s4350_s26 = scalar_lea.hbm %s4786_s14, 1024 }
  0xdb   : > { %s4825_s12 = scalar_lea.sflag [#allocation6], %s426_s30  ;;  %p4351_p9 = scmp.ne.s32.totalorder %s4786_s14, %s4350_s26 }
  0xdc   : > { %s4355_s28 = scalar_lea.hbm %s5419_s1, 4096  ;;  %p4356_p4 = scmp.lt.u32.totalorder %s4786_s14, %s5419_s1 }
  0xdd   : > { %p4353_p10 = pnand %p4351_p9, %p4322_p7  ;;  %p4357_p6 = scmp.lt.u32.totalorder %s4355_s28, %s4350_s26 }
  0xde   : > { %p4359_p12 = scmp.lt.u32.totalorder %s4350_s26, %s4786_s14 }
  0xdf   : > { %p4354_p3 = pneg %p4353_p10  ;;  %p4358_p8 = por %p4357_p6, %p4356_p4 }
  0xe1   : > { %p4360_p1 = por %p4359_p12, %p4358_p8 }
  0xe3   : > { %p4361_p13 = pnand %p4360_p1, %p4354_p3 }
  0xe5   : > { %4364 = shalt.err (!%p4361_p13)
}
  0xe6   : > { %s4365_s5 = scalar_lea.vmem %s4822_s3, 1024  ;;  %s4477_s11 = smov [#allocation5]  }
  0xe7   : > { %p4366_p0 = scmp.ne.s32.totalorder %s4822_s3, %s4365_s5  ;;  %s4370_s29 = sshll.u32 %s4477_s11, 4  ;;  %s4371_s29 = int_to_ptr.vmem [resolvable:$false] %s4370_s29 }
  0xe8   : > { %s4372_s0 = scalar_lea.vmem %s4371_s29, 2048  ;;  %p4373_p10 = scmp.lt.s32.totalorder %s4822_s3, %s4371_s29 }
  0xe9   : > { %p4368_p2 = pnand %p4366_p0, %p4322_p7  ;;  %p4374_p4 = scmp.lt.s32.totalorder %s4372_s0, %s4365_s5 }
  0xeb   : > { %p4369_p9 = pneg %p4368_p2  ;;  %p4375_p6 = por %p4374_p4, %p4373_p10 }
  0xed   : > { %p4376_p8 = pnand %p4375_p6, %p4369_p9 }
  0xef   : > { %4379 = shalt.err (!%p4376_p8)
}
  0xf0   : > { %3840 = dma.hbm_to_vmem [thread:$0]  (!%p4779_p11), %s4786_s14, 1024, %s4822_s3, %s4825_s12, %s5461_s13, %s5461_s13, %s5460_s27  }
  0xf1   : > { %p5462_p7 = scmp.ne.s32.totalorder %s5446_s24, 0 }
  0xf2   : > { %s4857_s30 = sand.u32 (!%p5462_p7), 1, %s4458_s18  }
  0xf3   : > { %449 = sbr.rel (%p5462_p7) target bundleno = 3461 (0xd85), region = 64  ;;  %s3222_s26 = sshll.u32 (!%p5462_p7), %s4857_s30, 6 }
  0xf4   : > { %s452_s15 = scalar_lea.sflag (!%p5462_p7), [#allocation3], %s4857_s30  ;;  %s4861_s6 = scalar_lea.vmem (!%p5462_p7), [#allocation2], %s3222_s26 }
  0xfa   : > { %4425 = dma.done.wait (%p4754_p5), %s452_s15, 1024  }
  0xfb   : > { %4427 = vsyncadd (%p4754_p5), %s452_s15, 4294966272  ;;  %s460_s3 = sand.u32 1, %s4563_s23   ;;  %s4868_s2 = scalar_lea.vmem [#allocation5], %s3222_s26 }
  0xfc   : > { %s461_s24 = scalar_lea.sflag [#allocation6], %s460_s3 }
  0xfd   : > { %4429 = dma.done.wait (%p4754_p5), %s461_s24, 1024  }
  0xfe   : > { %4431 = vsyncadd (%p4754_p5), %s461_s24, 4294966272  ;;  %p5463_p11 = scmp.eq.s32.totalorder %s4563_s23, 0 }
 0x100   : > { %4433 = dma.done.wait (%p5463_p11), [#allocation6], 1024   ;;  %p5464_p3 = pmov %p5463_p11 }
 0x102   : > { %4435 = vsyncadd (%p5464_p3), [#allocation6], 4294966272  ;;  %p5465_p12 = pmov %p5464_p3 }
 0x103   : > { %p5466_p1 = pmov %p5464_p3 }
 0x104   : > { %4437 = dma.done.wait (%p5465_p12), [#allocation9], 2048  }
 0x105   : > { %4439 = vsyncadd (%p5466_p1), [#allocation9], 4294965248  ;;  %p5467_p13 = pmov %p5466_p1 }
 0x106   : > { %p5468_p0 = pmov %p5466_p1 }
 0x107   : > { %4441 = dma.done.wait (%p5467_p13), [#allocation12], 2048  }
 0x108   : > { %4443 = vsyncadd (%p5468_p0), [#allocation12], 4294965248  ;;  %p5469_p5 = pmov %p5468_p0 }
 0x109   : > { %p5470_p2 = pmov %p5468_p0 }
 0x10a   : > { %4445 = dma.done.wait (%p5469_p5), [#allocation15], 1024  }
 0x10b   : > { %4447 = vsyncadd (%p5470_p2), [#allocation15], 4294966272  ;;  %v3904_v0 = vld [vmem:[#allocation7] sm:$0xff]   ;;  %v3905_v1 = vld [vmem:[#allocation7 + $0x8] sm:$0xff]   ;;  %v4478_v24 = vmov 0   ;;  %s5471_s12 = sld [smem:[#allocation29_spill]] }
 0x10c   : > { %3481 = vmatprep.subr.bf16.mxu0 %v3904_v0  ;;  %v3906_v2 = vld [vmem:[#allocation7 + $0x10] sm:$0xff]   ;;  %v3907_v3 = vld [vmem:[#allocation7 + $0x18] sm:$0xff]   ;;  %v3912_v4 = vld [vmem:[%s4861_s6] sm:$0xff]   ;;  %3902 = vset.pattern.permute.xlu1 %v4478_v24  ;;  %s3230_s28 = sshll.u32 %s4857_s30, 7  ;;  %s5472_s11 = sld [smem:[#allocation30_spill]] }
 0x10d   : > { %3482 = vmatpush3.bf16.msra.mxu0 %v3904_v0  ;;  %3497 = vmatprep.mubr.bf16.mxu0 %v3912_v4  ;;  %v3908_v5 = vld [vmem:[#allocation7 + $0x20] sm:$0xff]   ;;  %v3909_v6 = vld [vmem:[#allocation7 + $0x28] sm:$0xff]   ;;  %v3910_v9 = vld [vmem:[#allocation7 + $0x30] sm:$0xff]   ;;  %s5336_s29 = scalar_lea.vmem [#allocation16], %s3230_s28  ;;  %s3297_s0 = sshll.u32 %s4563_s23, 11 }
 0x10e   : > { %3483 = vmatprep.subr.bf16.mxu0 %v3905_v1  ;;  %v3920_v7 = vld [vmem:[#allocation8] sm:$0xff]   ;;  %v3921_v8 = vld [vmem:[#allocation8 + $0x8] sm:$0xff]   ;;  %v3922_v10 = vld [vmem:[#allocation8 + $0x10] sm:$0xff]   ;;  %3903 = vset.pattern.permute.xlu0 %v4478_v24  ;;  %s3053_s26 = sshll.u32 %s5336_s29, 4  ;;  %s5473_s3 = sld [smem:[#allocation31_spill]]  ;;  %s5371_s26 = int_to_ptr.vmem [resolvable:$true] %s3053_s26 }
 0x10f   : > { %3513 = vmatprep.subr.bf16.mxu1 %v3920_v7  ;;  %v3911_v11 = vld [vmem:[#allocation7 + $0x38] sm:$0xff]   ;;  %v3924_v13 = vld [vmem:[#allocation8 + $0x20] sm:$0xff]   ;;  %v3913_v14 = vld [vmem:[%s4861_s6 + $0x8] sm:$0xff]   ;;  %s3040_s23 = scalar_lea.sflag [#allocation4], %s4857_s30  ;;  %p5474_p10 = scmp.ne.s32.totalorder %s5456_s21, 0 }
 0x110   : > { %3514 = vmatpush3.bf16.msra.mxu1 %v3920_v7  ;;  %v3923_v12 = vld [vmem:[#allocation8 + $0x18] sm:$0xff]   ;;  %v3914_v15 = vld [vmem:[%s4861_s6 + $0x10] sm:$0xff]   ;;  %v3925_v16 = vld [vmem:[#allocation8 + $0x28] sm:$0xff]   ;;  %s4479_s7 = smov [#allocation16]  }
 0x111   : > { %3484 = vmatpush3.bf16.msra.mxu0 %v3905_v1  ;;  %3515 = vmatprep.subr.bf16.mxu1 %v3921_v8  ;;  %v3926_v17 = vld [vmem:[#allocation8 + $0x30] sm:$0xff]   ;;  %v3915_v18 = vld [vmem:[%s4861_s6 + $0x18] sm:$0xff]   ;;  %v3916_v19 = vld [vmem:[%s4861_s6 + $0x20] sm:$0xff]   ;;  %s4384_s14 = sshll.u32 %s4479_s7, 4  ;;  %s4385_s14 = int_to_ptr.vmem [resolvable:$false] %s4384_s14 }
 0x112   : > { %3485 = vmatprep.subr.bf16.mxu0 %v3906_v2  ;;  %v3917_v20 = vld [vmem:[%s4861_s6 + $0x28] sm:$0xff]   ;;  %v3918_v21 = vld [vmem:[%s4861_s6 + $0x30] sm:$0xff]   ;;  %v3919_v22 = vld [vmem:[%s4861_s6 + $0x38] sm:$0xff]   ;;  %s4386_s27 = scalar_lea.vmem %s4385_s14, 4096  ;;  %p4387_p8 = scmp.lt.s32.totalorder %s5371_s26, %s4385_s14 }
 0x113   : > { %v3927_v23 = vld [vmem:[#allocation8 + $0x38] sm:$0xff]  }
 0x114   : > { %3516 = vmatpush3.bf16.msra.mxu1 %v3921_v8  ;;  %s5369_s24 = scalar_lea.hbm %s5473_s3, %s3297_s0 }
 0x115   : > { %3486 = vmatpush3.bf16.msra.mxu0 %v3906_v2  ;;  %3517 = vmatprep.subr.bf16.mxu1 %v3922_v10 }
 0x116   : > { %3487 = vmatprep.subr.bf16.mxu0 %v3907_v3 }
 0x118   : > { %3518 = vmatpush3.bf16.msra.mxu1 %v3922_v10 }
 0x119   : > { %3488 = vmatpush3.bf16.msra.mxu0 %v3907_v3  ;;  %3519 = vmatprep.subr.bf16.mxu1 %v3923_v12 }
 0x11a   : > { %3489 = vmatprep.subr.bf16.mxu0 %v3908_v5 }
 0x11c   : > { %3520 = vmatpush3.bf16.msra.mxu1 %v3923_v12  ;;  %v1071_v12 = vlaneseq }
 0x11d   : > { %3490 = vmatpush3.bf16.msra.mxu0 %v3908_v5  ;;  %3521 = vmatprep.subr.bf16.mxu1 %v3924_v13 }
 0x11e   : > { %3491 = vmatprep.subr.bf16.mxu0 %v3909_v6 }
 0x120   : > { %3522 = vmatpush3.bf16.msra.mxu1 %v3924_v13 }
 0x121   : > { %3492 = vmatpush3.bf16.msra.mxu0 %v3909_v6  ;;  %3523 = vmatprep.subr.bf16.mxu1 %v3925_v16 }
 0x122   : > { %3493 = vmatprep.subr.bf16.mxu0 %v3910_v9 }
 0x124   : > { %3524 = vmatpush3.bf16.msra.mxu1 %v3925_v16 }
 0x125   : > { %3494 = vmatpush3.bf16.msra.mxu0 %v3910_v9  ;;  %3525 = vmatprep.subr.bf16.mxu1 %v3926_v17 }
 0x126   : > { %3495 = vmatprep.subr.bf16.mxu0 %v3911_v11 }
 0x128   : > { %3526 = vmatpush3.bf16.msra.mxu1 %v3926_v17 }
 0x129   : > { %3496 = vmatpush3.bf16.msra.mxu0 %v3911_v11  ;;  %3527 = vmatprep.subr.bf16.mxu1 %v3927_v23 }
 0x12c   : > { %3498 = vmatmul.mubr.bf16.vlgmr.msra.gmra.mrb[0].mxu0 %v3913_v14  ;;  %3528 = vmatpush3.bf16.msra.mxu1 %v3927_v23 }
 0x12d   : > { %3501 = vmatprep.mubr.bf16.mxu0 %v3914_v15  ;;  %v1072_v15 = vshrl.u32 %v1071_v12, 7 }
 0x134   : > { %3502 = vmatmul.mubr.bf16.gmra.mrb[4].mxu0 %v3915_v18  ;;  %v4912_v18 = vsub.s32 1, %v1072_v15 }
 0x135   : > { %3505 = vmatprep.mubr.bf16.mxu0 %v3916_v19 }
 0x13c   : > { %3506 = vmatmul.mubr.bf16.gmra.mrb[8].mxu0 %v3917_v20 }
 0x13d   : > { %3509 = vmatprep.mubr.bf16.mxu0 %v3918_v21  ;;  %v4918_v21 = vld [vmem:[%s4868_s2 + $0x38] sm:$0xff]  }
 0x144   : > { %3510 = vmatmul.mubr.bf16.gmra.mrb[12].mxu0 %v3919_v22  ;;  %v3299_v22 = vld [vmem:[%s4868_s2] sm:$0xff]  }
 0x1ff   : > { %v3499_v25 = vpop.f32.mrb[0].mxu0 }
 0x200   : > { %v727_v26 = vpop.f32.mrb[1].mxu0 }
 0x201   : > { %v3500_v27 = vpop.f32.mrb[2].mxu0 }
 0x202   : > { %v791_v28 = vpack.c.bf16 %v3500_v27, %v3499_v25  ;;  %v730_v29 = vpop.f32.mrb[3].mxu0  ;;  %v4925_v27 = vunpack.c.h.bf16 %v4918_v21 }
 0x203   : > { %v790_v30 = vpack.c.bf16 %v730_v29, %v727_v26 }
 0x205   : > { %3529 = vmatprep.mubr.bf16.mxu1 %v790_v30  ;;  %3545 = vmatprep.subr.bf16.mxu0 %v790_v30 }
 0x206   : > { %3530 = vmatmul.mubr.bf16.vlgmr.msra.gmra.mrb[0].mxu1 %v791_v28  ;;  %3546 = vmatpush3.bf16.msra.mxu0 %v790_v30 }
 0x207   : > { %v3503_v31 = vpop.f32.mrb[4].mxu0  ;;  %3547 = vmatprep.subr.bf16.mxu0 %v791_v28 }
 0x208   : > { %v743_v32 = vpop.f32.mrb[5].mxu0 }
 0x209   : > { %v3504_v33 = vpop.f32.mrb[6].mxu0 }
 0x20a   : > { %v793_v34 = vpack.c.bf16 %v3504_v33, %v3503_v31  ;;  %v746_v35 = vpop.f32.mrb[7].mxu0  ;;  %3548 = vmatpush3.bf16.msra.mxu0 %v791_v28  ;;  %v4927_v28 = vunpack.c.l.bf16 %v3299_v22 }
 0x20b   : > { %v792_v36 = vpack.c.bf16 %v746_v35, %v743_v32  ;;  %v4930_v35 = vunpack.c.h.bf16 %v3299_v22 }
 0x20d   : > { %3533 = vmatprep.mubr.bf16.mxu1 %v792_v36  ;;  %3549 = vmatprep.subr.bf16.mxu0 %v792_v36 }
 0x20e   : > { %3534 = vmatmul.mubr.bf16.gmra.mrb[4].mxu1 %v793_v34  ;;  %3550 = vmatpush3.bf16.msra.mxu0 %v792_v36 }
 0x20f   : > { %v3507_v37 = vpop.f32.mrb[8].mxu0  ;;  %3551 = vmatprep.subr.bf16.mxu0 %v793_v34 }
 0x210   : > { %v759_v38 = vpop.f32.mrb[9].mxu0 }
 0x211   : > { %v3508_v39 = vpop.f32.mrb[10].mxu0 }
 0x212   : > { %v795_v40 = vpack.c.bf16 %v3508_v39, %v3507_v37  ;;  %v762_v41 = vpop.f32.mrb[11].mxu0  ;;  %3552 = vmatpush3.bf16.msra.mxu0 %v793_v34 }
 0x213   : > { %v794_v42 = vpack.c.bf16 %v762_v41, %v759_v38 }
 0x215   : > { %3537 = vmatprep.mubr.bf16.mxu1 %v794_v42  ;;  %3553 = vmatprep.subr.bf16.mxu0 %v794_v42 }
 0x216   : > { %3538 = vmatmul.mubr.bf16.gmra.mrb[8].mxu1 %v795_v40  ;;  %3554 = vmatpush3.bf16.msra.mxu0 %v794_v42 }
 0x217   : > { %v3511_v43 = vpop.f32.mrb[12].mxu0  ;;  %3555 = vmatprep.subr.bf16.mxu0 %v795_v40 }
 0x218   : > { %v775_v44 = vpop.f32.mrb[13].mxu0 }
 0x219   : > { %v3512_v45 = vpop.f32.mrb[14].mxu0 }
 0x21a   : > { %v797_v46 = vpack.c.bf16 %v3512_v45, %v3511_v43  ;;  %v778_v47 = vpop.f32.mrb[15].mxu0  ;;  %3556 = vmatpush3.bf16.msra.mxu0 %v795_v40  ;;  %v3330_v40 = vld [vmem:[%s4868_s2 + $0x8] sm:$0xff]  }
 0x21b   : > { %v796_v48 = vpack.c.bf16 %v778_v47, %v775_v44  ;;  %v4942_v42 = vunpack.c.l.bf16 %v3330_v40  ;;  %v4949_v47 = vunpack.c.h.bf16 %v3330_v40 }
 0x21d   : > { %3541 = vmatprep.mubr.bf16.mxu1 %v796_v48  ;;  %3557 = vmatprep.subr.bf16.mxu0 %v796_v48 }
 0x21e   : > { %3542 = vmatmul.mubr.bf16.gmra.mrb[12].mxu1 %v797_v46  ;;  %3558 = vmatpush3.bf16.msra.mxu0 %v796_v48 }
 0x21f   : > { %3559 = vmatprep.subr.bf16.mxu0 %v797_v46 }
 0x222   : > { %3560 = vmatpush3.bf16.msra.mxu0 %v797_v46 }
 0x2d9   : > { %v3531_v49 = vpop.f32.mrb[0].mxu1 }
 0x2da   : > { %1003 = vperm.xlu1 %3902, %v3531_v49   ;;  %v896_v50 = vpop.f32.mrb[1].mxu1 }
 0x2db   : > { %993 = vperm.xlu0 %3903, %v896_v50   ;;  %v3532_v51 = vpop.f32.mrb[2].mxu1 }
 0x2dc   : > { %v899_v52 = vpop.f32.mrb[3].mxu1 }
 0x2de   : > { %1008 = vperm.xlu1 %3902, %v3532_v51  }
 0x2df   : > { %998 = vperm.xlu0 %3903, %v899_v52  }
 0x2e1   : > { %v3535_v53 = vpop.f32.mrb[4].mxu1 }
 0x2e2   : > { %v912_v54 = vpop.f32.mrb[5].mxu1 }
 0x2e3   : > { %1023 = vperm.xlu0 %3903, %v3535_v53   ;;  %v3536_v55 = vpop.f32.mrb[6].mxu1 }
 0x2e4   : > { %v915_v56 = vpop.f32.mrb[7].mxu1 }
 0x2e5   : > { %1018 = vperm.xlu1 %3902, %v915_v56  }
 0x2e7   : > { %1013 = vperm.xlu0 %3903, %v912_v54  }
 0x2e9   : > { %1028 = vperm.xlu1 %3902, %v3536_v55   ;;  %v3539_v57 = vpop.f32.mrb[8].mxu1 }
 0x2ea   : > { %v928_v58 = vpop.f32.mrb[9].mxu1 }
 0x2eb   : > { %1043 = vperm.xlu0 %3903, %v3539_v57   ;;  %v3540_v59 = vpop.f32.mrb[10].mxu1 }
 0x2ec   : > { %v931_v60 = vpop.f32.mrb[11].mxu1 }
 0x2ed   : > { %1038 = vperm.xlu1 %3902, %v931_v60  }
 0x2ef   : > { %1033 = vperm.xlu0 %3903, %v928_v58  }
 0x2f1   : > { %1048 = vperm.xlu1 %3902, %v3540_v59   ;;  %v3543_v61 = vpop.f32.mrb[12].mxu1 }
 0x2f2   : > { %v944_v62 = vpop.f32.mrb[13].mxu1 }
 0x2f3   : > { %1063 = vperm.xlu0 %3903, %v3543_v61   ;;  %v3544_v63 = vpop.f32.mrb[14].mxu1 }
 0x2f4   : > { %v947_v0 = vpop.f32.mrb[15].mxu1 }
 0x2f5   : > { %1058 = vperm.xlu1 %3902, %v947_v0  }
 0x2f7   : > { %1053 = vperm.xlu0 %3903, %v944_v62  }
 0x2f9   : > { %1068 = vperm.xlu1 %3902, %v3544_v63  }
 0x315   : > { %959 = vxpose.xlu0.b32.start [1/16] (narrow) %v896_v50, 8  ;;  %v3332_v50 = vld [vmem:[%s4868_s2 + $0x18] sm:$0xff]  }
 0x319   : > { %960 = vxpose.xlu0.b32.cont [2/16] (narrow) %v899_v52, 8 }
 0x31d   : > { %961 = vxpose.xlu0.b32.cont [3/16] (narrow) %v3531_v49, 8 }
 0x321   : > { %962 = vxpose.xlu0.b32.cont [4/16] (narrow) %v3532_v51, 8 }
 0x325   : > { %963 = vxpose.xlu0.b32.cont [5/16] (narrow) %v912_v54, 8 }
 0x329   : > { %964 = vxpose.xlu0.b32.cont [6/16] (narrow) %v915_v56, 8  ;;  %v3331_v56 = vld [vmem:[%s4868_s2 + $0x10] sm:$0xff]  }
 0x32d   : > { %965 = vxpose.xlu0.b32.cont [7/16] (narrow) %v3535_v53, 8  ;;  %v4957_v53 = vunpack.c.l.bf16 %v3332_v50 }
 0x331   : > { %966 = vxpose.xlu0.b32.cont [8/16] (narrow) %v3536_v55, 8 }
 0x335   : > { %967 = vxpose.xlu0.b32.cont [9/16] (narrow) %v928_v58, 8 }
 0x339   : > { %968 = vxpose.xlu0.b32.cont [10/16] (narrow) %v931_v60, 8 }
 0x33d   : > { %969 = vxpose.xlu0.b32.cont [11/16] (narrow) %v3539_v57, 8 }
 0x341   : > { %970 = vxpose.xlu0.b32.cont [12/16] (narrow) %v3540_v59, 8  ;;  %v4965_v59 = vunpack.c.l.bf16 %v3331_v56 }
 0x345   : > { %971 = vxpose.xlu0.b32.cont [13/16] (narrow) %v944_v62, 8 }
 0x349   : > { %972 = vxpose.xlu0.b32.cont [14/16] (narrow) %v947_v0, 8  ;;  %v4972_v0 = vunpack.c.h.bf16 %v3332_v50 }
 0x34d   : > { %973 = vxpose.xlu0.b32.cont [15/16] (narrow) %v3543_v61, 8 }
 0x351   : > { %974 = vxpose.xlu0.b32.end [16/16] (narrow) %v3544_v63, 8 }
 0x359   : > { %v1004_v3 = vpop.permute.xlu1 %1003 }
 0x35a   : > { %v994_v1 = vpop.permute.xlu0 %993 }
 0x35d   : > { %v1009_v5 = vpop.permute.xlu1 %1008 }
 0x35e   : > { %v999_v2 = vpop.permute.xlu0 %998 }
 0x362   : > { %v1024_v4 = vpop.permute.xlu0 %1023 }
 0x364   : > { %v1019_v6 = vpop.permute.xlu1 %1018 }
 0x366   : > { %v1014_v7 = vpop.permute.xlu0 %1013 }
 0x368   : > { %v1029_v8 = vpop.permute.xlu1 %1028 }
 0x36a   : > { %v4898_v9 = vpop.permute.xlu0 %1043 }
 0x36c   : > { %v4900_v10 = vpop.permute.xlu1 %1038 }
 0x36e   : > { %v4902_v11 = vpop.permute.xlu0 %1033 }
 0x370   : > { %v4904_v13 = vpop.permute.xlu1 %1048 }
 0x372   : > { %v4906_v14 = vpop.permute.xlu0 %1063 }
 0x374   : > { %v4908_v16 = vpop.permute.xlu1 %1058 }
 0x376   : > { %v4910_v17 = vpop.permute.xlu0 %1053 }
 0x378   : > { %v1069_v23 = vpop.permute.xlu1 %1068 }
 0x395   : > { %v975_v19 = vpop.trf.xlu0 }
 0x396   : > { %v4915_v20 = vrot.slane %v975_v19, %v4912_v18 }
 0x398   : > { %v1090_v24 = vadd.f32 %v4915_v20, %v1069_v23  ;;  %v1075_v25 = vadd.f32 %v4915_v20, %v994_v1  ;;  %v1076_v26 = vadd.f32 %v4915_v20, %v999_v2  ;;  %v1077_v32 = vadd.f32 %v4915_v20, %v1004_v3  ;;  %v3333_v23 = vld [vmem:[%s4868_s2 + $0x20] sm:$0xff]  }
 0x399   : > { %v1078_v36 = vadd.f32 %v4915_v20, %v1009_v5  ;;  %v1081_v46 = vadd.f32 %v4915_v20, %v1024_v4  ;;  %v1079_v52 = vadd.f32 %v4915_v20, %v1014_v7  ;;  %v1082_v58 = vadd.f32 %v4915_v20, %v1029_v8  ;;  %v3334_v8 = vld [vmem:[%s4868_s2 + $0x28] sm:$0xff]  }
 0x39a   : > { %v1106_v29 = vmul.f32 0.2, %v1090_v24  ;;  %v1091_v30 = vmul.f32 0.2, %v1075_v25  ;;  %v1092_v31 = vmul.f32 0.2, %v1076_v26  ;;  %v1080_v63 = vadd.f32 %v4915_v20, %v1019_v6 }
 0x39b   : > { %v1093_v41 = vmul.f32 0.2, %v1077_v32  ;;  %v1094_v45 = vmul.f32 0.2, %v1078_v36  ;;  %v1097_v51 = vmul.f32 0.2, %v1081_v46  ;;  %v1085_v4 = vadd.f32 %v4915_v20, %v4898_v9 }
 0x39c   : > { %v1122_v33 = vmax.f32 %v1090_v24, %v1106_v29  ;;  %v1107_v34 = vmax.f32 %v1075_v25, %v1091_v30  ;;  %v1108_v39 = vmax.f32 %v1076_v26, %v1092_v31  ;;  %v1095_v57 = vmul.f32 0.2, %v1079_v52 }
 0x39d   : > { %v1109_v44 = vmax.f32 %v1077_v32, %v1093_v41  ;;  %v1110_v49 = vmax.f32 %v1078_v36, %v1094_v45  ;;  %v1113_v55 = vmax.f32 %v1081_v46, %v1097_v51  ;;  %v1098_v62 = vmul.f32 0.2, %v1082_v58  ;;  %v3335_v41 = vld [vmem:[%s4868_s2 + $0x30] sm:$0xff]   ;;  %s4380_s2 = scalar_lea.vmem %s5371_s26, 2048 }
 0x39e   : > { %v4934_v37 = vadd.f32 %v4925_v27, %v1122_v33  ;;  %v4937_v38 = vadd.f32 %v4927_v28, %v1107_v34  ;;  %v4945_v43 = vadd.f32 %v4930_v35, %v1108_v39  ;;  %v1111_v61 = vmax.f32 %v1079_v52, %v1095_v57  ;;  %p4381_p9 = scmp.ne.s32.totalorder %s5371_s26, %s4380_s2  ;;  %p4388_p7 = scmp.lt.s32.totalorder %s4386_s27, %s4380_s2 }
 0x39f   : > { %v4952_v48 = vadd.f32 %v4942_v42, %v1109_v44  ;;  %v4960_v54 = vadd.f32 %v4949_v47, %v1110_v49  ;;  %v4968_v60 = vadd.f32 %v4957_v53, %v1113_v55  ;;  %v1114_v2 = vmax.f32 %v1082_v58, %v1098_v62 }
 0x3a0   : > { %1169 = vmax.xlane.f32.xlu0 %v4934_v37  ;;  %1139 = vmax.xlane.f32.xlu1 %v4937_v38  ;;  %v4975_v1 = vadd.f32 %v4965_v59, %v1111_v61  ;;  %v1096_v3 = vmul.f32 0.2, %v1080_v63  ;;  %v4980_v5 = vunpack.c.h.bf16 %v3331_v56  ;;  %v1101_v12 = vmul.f32 0.2, %v1085_v4  ;;  %p4382_p4 = pnand %p4381_p9, %p5474_p10  ;;  %p4389_p11 = por %p4388_p7, %p4387_p8 }
 0x3a1   : > { %v4983_v7 = vadd.f32 %v4972_v0, %v1114_v2  ;;  %v1083_v15 = vadd.f32 %v4915_v20, %v4902_v11  ;;  %v4989_v19 = vunpack.c.l.bf16 %v3334_v8  ;;  %v1086_v25 = vadd.f32 %v4915_v20, %v4904_v13 }
 0x3a2   : > { %v1112_v6 = vmax.f32 %v1080_v63, %v1096_v3  ;;  %v1117_v9 = vmax.f32 %v1085_v4, %v1101_v12  ;;  %v4998_v26 = vunpack.c.l.bf16 %v3333_v23  ;;  %v1084_v31 = vadd.f32 %v4915_v20, %v4900_v10  ;;  %p4383_p6 = pneg %p4382_p4 }
 0x3a3   : > { %v1099_v24 = vmul.f32 0.2, %v1083_v15  ;;  %v1102_v30 = vmul.f32 0.2, %v1086_v25  ;;  %v5006_v32 = vunpack.c.h.bf16 %v3334_v8  ;;  %v1087_v36 = vadd.f32 %v4915_v20, %v4910_v17 }
 0x3a4   : > { %1141 = vmax.xlane.f32.xlu1 %v4945_v43  ;;  %v4992_v22 = vadd.f32 %v4980_v5, %v1112_v6  ;;  %v5001_v11 = vadd.f32 %v4989_v19, %v1117_v9  ;;  %v1100_v34 = vmul.f32 0.2, %v1084_v31  ;;  %v5014_v39 = vunpack.c.h.bf16 %v3333_v23  ;;  %p4390_p3 = pnand %p4389_p11, %p4383_p6 }
 0x3a5   : > { %v1115_v29 = vmax.f32 %v1083_v15, %v1099_v24  ;;  %v1118_v13 = vmax.f32 %v1086_v25, %v1102_v30  ;;  %v1103_v44 = vmul.f32 0.2, %v1087_v36  ;;  %v1088_v45 = vadd.f32 %v4915_v20, %v4908_v16 }
 0x3a6   : > { %v1116_v10 = vmax.f32 %v1084_v31, %v1100_v34  ;;  %v5023_v46 = vunpack.c.l.bf16 %v3335_v41  ;;  %v1089_v51 = vadd.f32 %v4915_v20, %v4906_v14  ;;  %v5034_v55 = vunpack.c.h.bf16 %v3335_v41 }
 0x3a7   : > { %v5009_v33 = vadd.f32 %v4998_v26, %v1115_v29  ;;  %v5017_v40 = vadd.f32 %v5006_v32, %v1118_v13  ;;  %v1119_v17 = vmax.f32 %v1087_v36, %v1103_v44  ;;  %v1104_v50 = vmul.f32 0.2, %v1088_v45 }
 0x3a8   : > { %1143 = vmax.xlane.f32.xlu1 %v4952_v48  ;;  %v5026_v49 = vadd.f32 %v5014_v39, %v1116_v10  ;;  %v1105_v56 = vmul.f32 0.2, %v1089_v51  ;;  %v5041_v58 = vunpack.c.l.bf16 %v4918_v21 }
 0x3a9   : > { %v5032_v52 = vadd.f32 %v5023_v46, %v1119_v17  ;;  %v1120_v16 = vmax.f32 %v1088_v45, %v1104_v50 }
 0x3aa   : > { %v1121_v61 = vmax.f32 %v1089_v51, %v1105_v56 }
 0x3ab   : > { %v5038_v57 = vadd.f32 %v5034_v55, %v1120_v16 }
 0x3ac   : > { %1145 = vmax.xlane.f32.xlu1 %v4960_v54  ;;  %v5045_v14 = vadd.f32 %v5041_v58, %v1121_v61 }
 0x3b0   : > { %1151 = vmax.xlane.f32.xlu1 %v4968_v60 }
 0x3b4   : > { %1147 = vmax.xlane.f32.xlu1 %v4975_v1 }
 0x3b8   : > { %1153 = vmax.xlane.f32.xlu1 %v4983_v7 }
 0x3bc   : > { %1149 = vmax.xlane.f32.xlu1 %v4992_v22 }
 0x3c0   : > { %1159 = vmax.xlane.f32.xlu1 %v5001_v11 }
 0x3c4   : > { %1155 = vmax.xlane.f32.xlu1 %v5009_v33 }
 0x3c8   : > { %1161 = vmax.xlane.f32.xlu1 %v5017_v40 }
 0x3cc   : > { %1157 = vmax.xlane.f32.xlu1 %v5026_v49 }
 0x3d0   : > { %1163 = vmax.xlane.f32.xlu1 %v5032_v52 }
 0x3d4   : > { %1165 = vmax.xlane.f32.xlu1 %v5038_v57 }
 0x3d8   : > { %1167 = vmax.xlane.f32.xlu1 %v5045_v14 }
 0x42d   : > { %v1140_v20 = vpop.xlane.xlu1 %1139 }
 0x42e   : > { %v1171_v62 = vsub.f32 %v4937_v38, %v1140_v20 }
 0x430   : > { %v1187_v63 = vmul.f32 1.442695, %v1171_v62 }
 0x431   : > { %v1142_v2 = vpop.xlane.xlu1 %1141 }
 0x432   : > { %v1172_v3 = vsub.f32 %v4945_v43, %v1142_v2  ;;  %3960 = vpow2.f32 %v1187_v63 }
 0x434   : > { %v1189_v4 = vmul.f32 1.442695, %v1172_v3 }
 0x435   : > { %v1144_v6 = vpop.xlane.xlu1 %1143 }
 0x436   : > { %3962 = vpow2.f32 %v1189_v4  ;;  %v1173_v21 = vsub.f32 %v4952_v48, %v1144_v6 }
 0x438   : > { %v1191_v8 = vmul.f32 1.442695, %v1173_v21 }
 0x439   : > { %v1146_v12 = vpop.xlane.xlu1 %1145 }
 0x43a   : > { %3964 = vpow2.f32 %v1191_v8  ;;  %v1174_v15 = vsub.f32 %v4960_v54, %v1146_v12  ;;  %v1170_v12 = vpop.xlane.xlu0 %1169 }
 0x43c   : > { %v1193_v9 = vmul.f32 1.442695, %v1174_v15  ;;  %v3961_v23 = vpop.eup %3960  ;;  %v1186_v15 = vsub.f32 %v4934_v37, %v1170_v12  ;;  %v5067_v12 = vld [vmem:[%s5422_s4] ss:$0 sm:$0xff] }
 0x43d   : > { %v1152_v24 = vpop.xlane.xlu1 %1151  ;;  %1219 = vadd.xlane.f32.xlu1 %v3961_v23 }
 0x43e   : > { %3966 = vpow2.f32 %v1193_v9  ;;  %v1177_v38 = vsub.f32 %v4968_v60, %v1152_v24 }
 0x440   : > { %v3963_v25 = vpop.eup %3962  ;;  %v1199_v43 = vmul.f32 1.442695, %v1177_v38 }
 0x441   : > { %v1148_v29 = vpop.xlane.xlu1 %1147  ;;  %v1251_v30 = vpack.c.bf16 %v3963_v25, %v3961_v23  ;;  %1221 = vadd.xlane.f32.xlu1 %v3963_v25  ;;  %v1217_v25 = vmul.f32 1.442695, %v1186_v15 }
 0x442   : > { %3968 = vpow2.f32 %v1199_v43  ;;  %v1175_v48 = vsub.f32 %v4975_v1, %v1148_v29 }
 0x443   : > { %3561 = vmatprep.mubr.bf16.mxu0 %v1251_v30 }
 0x444   : > { %v3965_v31 = vpop.eup %3964  ;;  %v1195_v13 = vmul.f32 1.442695, %v1175_v48 }
 0x445   : > { %v1154_v34 = vpop.xlane.xlu1 %1153  ;;  %1223 = vadd.xlane.f32.xlu1 %v3965_v31 }
 0x446   : > { %3970 = vpow2.f32 %v1195_v13  ;;  %v1178_v54 = vsub.f32 %v4983_v7, %v1154_v34 }
 0x448   : > { %v3967_v36 = vpop.eup %3966  ;;  %v1201_v10 = vmul.f32 1.442695, %v1178_v54 }
 0x449   : > { %v1150_v41 = vpop.xlane.xlu1 %1149  ;;  %v1252_v60 = vpack.c.bf16 %v3967_v36, %v3965_v31  ;;  %1225 = vadd.xlane.f32.xlu1 %v3967_v36 }
 0x44a   : > { %3972 = vpow2.f32 %v1201_v10  ;;  %v1176_v44 = vsub.f32 %v4992_v22, %v1150_v41  ;;  %v3928_v10 = vld [vmem:[#allocation10] sm:$0xff]   ;;  %v3929_v41 = vld [vmem:[#allocation10 + $0x8] sm:$0xff]  }
 0x44b   : > { %3562 = vmatmul.mubr.bf16.vlgmr.msra.gmra.mrb[16].mxu0 %v1252_v60  ;;  %3577 = vmatprep.subr.bf16.mxu1 %v3928_v10  ;;  %v3930_v60 = vld [vmem:[#allocation10 + $0x10] sm:$0xff]  }
 0x44c   : > { %v3969_v45 = vpop.eup %3968  ;;  %v1197_v17 = vmul.f32 1.442695, %v1176_v44  ;;  %3578 = vmatpush3.bf16.msra.mxu1 %v3928_v10  ;;  %v3931_v44 = vld [vmem:[#allocation10 + $0x18] sm:$0xff]  }
 0x44d   : > { %v1160_v1 = vpop.xlane.xlu1 %1159  ;;  %1231 = vadd.xlane.f32.xlu1 %v3969_v45  ;;  %3579 = vmatprep.subr.bf16.mxu1 %v3929_v41 }
 0x44e   : > { %3974 = vpow2.f32 %v1197_v17  ;;  %v1181_v22 = vsub.f32 %v5001_v11, %v1160_v1  ;;  %v3933_v17 = vld [vmem:[#allocation10 + $0x28] sm:$0xff]   ;;  %v3934_v1 = vld [vmem:[#allocation10 + $0x30] sm:$0xff]  }
 0x450   : > { %v3971_v50 = vpop.eup %3970  ;;  %v1207_v21 = vmul.f32 1.442695, %v1181_v22  ;;  %3580 = vmatpush3.bf16.msra.mxu1 %v3929_v41  ;;  %v3942_v22 = vld [vmem:[#allocation11 + $0x30] sm:$0xff]  }
 0x451   : > { %v1156_v51 = vpop.xlane.xlu1 %1155  ;;  %1227 = vadd.xlane.f32.xlu1 %v3971_v50  ;;  %3581 = vmatprep.subr.bf16.mxu1 %v3930_v60 }
 0x452   : > { %v1179_v16 = vsub.f32 %v5009_v33, %v1156_v51  ;;  %v3936_v51 = vld [vmem:[#allocation11] sm:$0xff]  }
 0x453   : > { %3609 = vmatprep.subr.bf16.mxu0 %v3936_v51 }
 0x454   : > { %v3973_v7 = vpop.eup %3972  ;;  %v1203_v56 = vmul.f32 1.442695, %v1179_v16  ;;  %3582 = vmatpush3.bf16.msra.mxu1 %v3930_v60  ;;  %v3937_v16 = vld [vmem:[#allocation11 + $0x8] sm:$0xff]   ;;  %3610 = vmatpush3.bf16.msra.mxu0 %v3936_v51 }
 0x455   : > { %v1162_v61 = vpop.xlane.xlu1 %1161  ;;  %1233 = vadd.xlane.f32.xlu1 %v3973_v7  ;;  %v1254_v6 = vpack.c.bf16 %v3973_v7, %v3969_v45  ;;  %3583 = vmatprep.subr.bf16.mxu1 %v3931_v44  ;;  %v3932_v45 = vld [vmem:[#allocation10 + $0x20] sm:$0xff]   ;;  %v3938_v7 = vld [vmem:[#allocation11 + $0x10] sm:$0xff]  }
 0x456   : > { %3976 = vpow2.f32 %v1203_v56  ;;  %v1182_v20 = vsub.f32 %v5017_v40, %v1162_v61  ;;  %3611 = vmatprep.subr.bf16.mxu0 %v3937_v16  ;;  %v3939_v56 = vld [vmem:[#allocation11 + $0x18] sm:$0xff]   ;;  %v3940_v61 = vld [vmem:[#allocation11 + $0x20] sm:$0xff]  }
 0x458   : > { %v3975_v62 = vpop.eup %3974  ;;  %v1209_v63 = vmul.f32 1.442695, %v1182_v20  ;;  %3584 = vmatpush3.bf16.msra.mxu1 %v3931_v44  ;;  %3612 = vmatpush3.bf16.msra.mxu0 %v3937_v16  ;;  %v3941_v20 = vld [vmem:[#allocation11 + $0x28] sm:$0xff]  }
 0x459   : > { %v1158_v2 = vpop.xlane.xlu1 %1157  ;;  %v1253_v3 = vpack.c.bf16 %v3975_v62, %v3971_v50  ;;  %1229 = vadd.xlane.f32.xlu1 %v3975_v62  ;;  %3585 = vmatprep.subr.bf16.mxu1 %v3932_v45  ;;  %v3935_v50 = vld [vmem:[#allocation10 + $0x38] sm:$0xff]  }
 0x45a   : > { %3978 = vpow2.f32 %v1209_v63  ;;  %v1180_v4 = vsub.f32 %v5026_v49, %v1158_v2  ;;  %3613 = vmatprep.subr.bf16.mxu0 %v3938_v7 }
 0x45b   : > { %3565 = vmatprep.mubr.bf16.mxu0 %v1253_v3 }
 0x45c   : > { %v1205_v33 = vmul.f32 1.442695, %v1180_v4  ;;  %3566 = vmatmul.mubr.bf16.gmra.mrb[20].mxu0 %v1254_v6  ;;  %3586 = vmatpush3.bf16.msra.mxu1 %v3932_v45 }
 0x45d   : > { %v1164_v8 = vpop.xlane.xlu1 %1163  ;;  %3587 = vmatprep.subr.bf16.mxu1 %v3933_v17  ;;  %3614 = vmatpush3.bf16.msra.mxu0 %v3938_v7 }
 0x45e   : > { %3980 = vpow2.f32 %v1205_v33  ;;  %v1183_v40 = vsub.f32 %v5032_v52, %v1164_v8  ;;  %3615 = vmatprep.subr.bf16.mxu0 %v3939_v56 }
 0x45f   : > { %3982 = vpow2.f32 %v1207_v21 }
 0x460   : > { %v3977_v11 = vpop.eup %3976  ;;  %v1211_v9 = vmul.f32 1.442695, %v1183_v40  ;;  %3588 = vmatpush3.bf16.msra.mxu1 %v3933_v17 }
 0x461   : > { %1235 = vadd.xlane.f32.xlu1 %v3977_v11  ;;  %v1166_v23 = vpop.xlane.xlu1 %1165  ;;  %3589 = vmatprep.subr.bf16.mxu1 %v3934_v1 }
 0x462   : > { %v1184_v24 = vsub.f32 %v5038_v57, %v1166_v23  ;;  %3984 = vpow2.f32 %v1211_v9  ;;  %3616 = vmatpush3.bf16.msra.mxu0 %v3939_v56 }
 0x463   : > { %3617 = vmatprep.subr.bf16.mxu0 %v3940_v61 }
 0x464   : > { %v3979_v49 = vpop.eup %3978  ;;  %v1213_v38 = vmul.f32 1.442695, %v1184_v24  ;;  %3590 = vmatpush3.bf16.msra.mxu1 %v3934_v1 }
 0x465   : > { %1241 = vadd.xlane.f32.xlu0 %v3979_v49  ;;  %v1168_v43 = vpop.xlane.xlu1 %1167  ;;  %3591 = vmatprep.subr.bf16.mxu1 %v3935_v50 }
 0x466   : > { %3986 = vpow2.f32 %v1213_v38  ;;  %v1185_v29 = vsub.f32 %v5045_v14, %v1168_v43  ;;  %3618 = vmatpush3.bf16.msra.mxu0 %v3940_v61 }
 0x467   : > { %3988 = vpow2.f32 %v1217_v25  ;;  %3619 = vmatprep.subr.bf16.mxu0 %v3941_v20 }
 0x468   : > { %v3981_v30 = vpop.eup %3980  ;;  %v1215_v52 = vmul.f32 1.442695, %v1185_v29  ;;  %3592 = vmatpush3.bf16.msra.mxu1 %v3935_v50 }
 0x469   : > { %v3983_v48 = vpop.eup %3982  ;;  %1237 = vadd.xlane.f32.xlu1 %v3981_v30  ;;  %v1255_v37 = vpack.c.bf16 %v3981_v30, %v3977_v11 }
 0x46a   : > { %3990 = vpow2.f32 %v1215_v52  ;;  %v1256_v31 = vpack.c.bf16 %v3979_v49, %v3983_v48  ;;  %3620 = vmatpush3.bf16.msra.mxu0 %v3941_v20 }
 0x46b   : > { %3569 = vmatprep.mubr.bf16.mxu0 %v1255_v37  ;;  %3621 = vmatprep.subr.bf16.mxu0 %v3942_v22 }
 0x46c   : > { %3570 = vmatmul.mubr.bf16.gmra.mrb[24].mxu0 %v1256_v31  ;;  %v3985_v57 = vpop.eup %3984 }
 0x46d   : > { %1239 = vadd.xlane.f32.xlu1 %v3983_v48 }
 0x46e   : > { %3622 = vmatpush3.bf16.msra.mxu0 %v3942_v22 }
 0x470   : > { %v3987_v13 = vpop.eup %3986 }
 0x471   : > { %1243 = vadd.xlane.f32.xlu1 %v3985_v57  ;;  %1245 = vadd.xlane.f32.xlu0 %v3987_v13  ;;  %v1257_v34 = vpack.c.bf16 %v3987_v13, %v3985_v57  ;;  %v3989_v54 = vpop.eup %3988 }
 0x473   : > { %3573 = vmatprep.mubr.bf16.mxu0 %v1257_v34 }
 0x474   : > { %v3991_v36 = vpop.eup %3990 }
 0x475   : > { %1249 = vadd.xlane.f32.xlu0 %v3989_v54  ;;  %1247 = vadd.xlane.f32.xlu1 %v3991_v36  ;;  %v1258_v14 = vpack.c.bf16 %v3989_v54, %v3991_v36 }
 0x477   : > { %3574 = vmatmul.mubr.bf16.gmra.mrb[28].mxu0 %v1258_v14 }
 0x4ca   : > { %v1220_v62 = vpop.xlane.xlu1 %1219 }
 0x4ce   : > { %v1222_v63 = vpop.xlane.xlu1 %1221 }
 0x4d2   : > { %v1224_v2 = vpop.xlane.xlu1 %1223 }
 0x4d3   : > { %3992 = vrcp.f32 %v1224_v2 }
 0x4d4   : > { %3994 = vrcp.f32 %v1220_v62 }
 0x4d6   : > { %v1226_v3 = vpop.xlane.xlu1 %1225 }
 0x4d7   : > { %3996 = vrcp.f32 %v1226_v3 }
 0x4d8   : > { %3998 = vrcp.f32 %v1222_v63 }
 0x4da   : > { %v1232_v4 = vpop.xlane.xlu1 %1231 }
 0x4db   : > { %4000 = vrcp.f32 %v1232_v4 }
 0x4dd   : > { %v3993_v33 = vpop.eup %3992 }
 0x4de   : > { %v1228_v6 = vpop.xlane.xlu1 %1227  ;;  %v3995_v40 = vpop.eup %3994 }
 0x4df   : > { %4002 = vrcp.f32 %v1228_v6 }
 0x4e1   : > { %v3997_v9 = vpop.eup %3996 }
 0x4e2   : > { %v1234_v21 = vpop.xlane.xlu1 %1233  ;;  %v3999_v49 = vpop.eup %3998 }
 0x4e3   : > { %4004 = vrcp.f32 %v1234_v21 }
 0x4e5   : > { %v4001_v41 = vpop.eup %4000 }
 0x4e6   : > { %v1230_v52 = vpop.xlane.xlu1 %1229 }
 0x4e7   : > { %4006 = vrcp.f32 %v1230_v52 }
 0x4e9   : > { %v4003_v44 = vpop.eup %4002 }
 0x4ed   : > { %v4005_v1 = vpop.eup %4004 }
 0x4ee   : > { %v1236_v54 = vpop.xlane.xlu1 %1235 }
 0x4f1   : > { %v4007_v7 = vpop.eup %4006 }
 0x4f2   : > { %v1242_v63 = vpop.xlane.xlu0 %1241 }
 0x4f6   : > { %v1238_v10 = vpop.xlane.xlu1 %1237 }
 0x4fa   : > { %v1240_v50 = vpop.xlane.xlu1 %1239 }
 0x4fb   : > { %4008 = vrcp.f32 %v1240_v50 }
 0x4fc   : > { %4010 = vrcp.f32 %v1236_v54 }
 0x4fd   : > { %4012 = vrcp.f32 %v1242_v63 }
 0x4fe   : > { %v1244_v21 = vpop.xlane.xlu1 %1243  ;;  %4014 = vrcp.f32 %v1238_v10 }
 0x51e   : > { %v3563_v8 = vpop.f32.mrb[16].mxu0 }
 0x51f   : > { %v1374_v11 = vmul.f32 %v3993_v33, %v3563_v8  ;;  %v1293_v15 = vpop.f32.mrb[17].mxu0 }
 0x520   : > { %v1372_v23 = vmul.f32 %v3995_v40, %v1293_v15  ;;  %v3564_v24 = vpop.f32.mrb[18].mxu0 }
 0x521   : > { %v1397_v38 = vadd.f32 %v5067_v12, %v1374_v11  ;;  %v1375_v25 = vmul.f32 %v3997_v9, %v3564_v24  ;;  %v1296_v43 = vpop.f32.mrb[19].mxu0  ;;  %v1246_v11 = vpop.xlane.xlu0 %1245 }
 0x522   : > { %v1395_v29 = vadd.f32 %v5067_v12, %v1372_v23  ;;  %v1373_v30 = vmul.f32 %v3999_v49, %v1296_v43  ;;  %v1248_v9 = vpop.xlane.xlu1 %1247  ;;  %v4009_v23 = vpop.eup %4008 }
 0x523   : > { %v1398_v48 = vadd.f32 %v5067_v12, %v1375_v25  ;;  %v1413_v31 = vmax.f32 %v1397_v38, 0.0  ;;  %v4011_v38 = vpop.eup %4010  ;;  %4016 = vrcp.f32 %v1248_v9  ;;  %v3943_v9 = vld [vmem:[#allocation11 + $0x38] sm:$0xff]  }
 0x524   : > { %v1396_v37 = vadd.f32 %v5067_v12, %v1373_v30  ;;  %v1411_v13 = vmax.f32 %v1395_v29, 0.0  ;;  %v4013_v29 = vpop.eup %4012  ;;  %4018 = vrcp.f32 %v1244_v21  ;;  %3623 = vmatprep.subr.bf16.mxu0 %v3943_v9 }
 0x525   : > { %v1414_v57 = vmax.f32 %v1398_v48, 0.0  ;;  %v1250_v24 = vpop.xlane.xlu0 %1249  ;;  %v4015_v48 = vpop.eup %4014  ;;  %3624 = vmatpush3.bf16.msra.mxu0 %v3943_v9 }
 0x526   : > { %v1412_v34 = vmax.f32 %v1396_v37, 0.0  ;;  %4020 = vrcp.f32 %v1250_v24 }
 0x527   : > { %v1428_v36 = vpack.c.bf16 %v1414_v57, %v1413_v31  ;;  %4022 = vrcp.f32 %v1246_v11 }
 0x528   : > { %v1427_v14 = vpack.c.bf16 %v1412_v34, %v1411_v13 }
 0x52a   : > { %3593 = vmatprep.mubr.bf16.mxu1 %v1427_v14 }
 0x52b   : > { %3594 = vmatmul.mubr.bf16.vlgmr.msra.gmra.mrb[16].mxu1 %v1428_v36 }
 0x52f   : > { %v3567_v60 = vpop.f32.mrb[20].mxu0 }
 0x530   : > { %v1378_v45 = vmul.f32 %v4001_v41, %v3567_v60  ;;  %v1309_v17 = vpop.f32.mrb[21].mxu0 }
 0x531   : > { %v1376_v51 = vmul.f32 %v4003_v44, %v1309_v17  ;;  %v3568_v16 = vpop.f32.mrb[22].mxu0  ;;  %v4017_v17 = vpop.eup %4016 }
 0x532   : > { %v1401_v56 = vadd.f32 %v5067_v12, %v1378_v45  ;;  %v1379_v61 = vmul.f32 %v4005_v1, %v3568_v16  ;;  %v1312_v20 = vpop.f32.mrb[23].mxu0  ;;  %v4019_v50 = vpop.eup %4018 }
 0x533   : > { %v1399_v22 = vadd.f32 %v5067_v12, %v1376_v51  ;;  %v1377_v62 = vmul.f32 %v4007_v7, %v1312_v20  ;;  %v4021_v7 = vpop.eup %4020 }
 0x534   : > { %v1402_v2 = vadd.f32 %v5067_v12, %v1379_v61  ;;  %v1417_v4 = vmax.f32 %v1401_v56, 0.0  ;;  %v4023_v20 = vpop.eup %4022 }
 0x535   : > { %v1400_v3 = vadd.f32 %v5067_v12, %v1377_v62  ;;  %v1415_v33 = vmax.f32 %v1399_v22, 0.0 }
 0x536   : > { %v1418_v6 = vmax.f32 %v1402_v2, 0.0 }
 0x537   : > { %v1416_v8 = vmax.f32 %v1400_v3, 0.0 }
 0x538   : > { %v1430_v40 = vpack.c.bf16 %v1418_v6, %v1417_v4 }
 0x539   : > { %v1429_v15 = vpack.c.bf16 %v1416_v8, %v1415_v33 }
 0x53b   : > { %3597 = vmatprep.mubr.bf16.mxu1 %v1429_v15 }
 0x53c   : > { %3598 = vmatmul.mubr.bf16.gmra.mrb[20].mxu1 %v1430_v40 }
 0x53f   : > { %v3571_v49 = vpop.f32.mrb[24].mxu0 }
 0x540   : > { %v1382_v25 = vmul.f32 %v4009_v23, %v3571_v49  ;;  %v1325_v43 = vpop.f32.mrb[25].mxu0 }
 0x541   : > { %v1380_v30 = vmul.f32 %v4011_v38, %v1325_v43  ;;  %v3572_v52 = vpop.f32.mrb[26].mxu0 }
 0x542   : > { %v1405_v37 = vadd.f32 %v5067_v12, %v1382_v25  ;;  %v1383_v31 = vmul.f32 %v4013_v29, %v3572_v52  ;;  %v1328_v57 = vpop.f32.mrb[27].mxu0 }
 0x543   : > { %v1403_v13 = vadd.f32 %v5067_v12, %v1380_v30  ;;  %v1381_v34 = vmul.f32 %v4015_v48, %v1328_v57 }
 0x544   : > { %v1406_v54 = vadd.f32 %v5067_v12, %v1383_v31  ;;  %v1421_v14 = vmax.f32 %v1405_v37, 0.0 }
 0x545   : > { %v1404_v36 = vadd.f32 %v5067_v12, %v1381_v34  ;;  %v1419_v41 = vmax.f32 %v1403_v13, 0.0 }
 0x546   : > { %v1422_v10 = vmax.f32 %v1406_v54, 0.0 }
 0x547   : > { %v1420_v60 = vmax.f32 %v1404_v36, 0.0 }
 0x548   : > { %v1432_v44 = vpack.c.bf16 %v1422_v10, %v1421_v14 }
 0x549   : > { %v1431_v45 = vpack.c.bf16 %v1420_v60, %v1419_v41 }
 0x54a   : > { %v3575_v1 = vpop.f32.mrb[28].mxu0 }
 0x54b   : > { %v1386_v51 = vmul.f32 %v4017_v17, %v3575_v1  ;;  %v1341_v16 = vpop.f32.mrb[29].mxu0  ;;  %3601 = vmatprep.mubr.bf16.mxu1 %v1431_v45 }
 0x54c   : > { %v1384_v56 = vmul.f32 %v4019_v50, %v1341_v16  ;;  %v3576_v61 = vpop.f32.mrb[30].mxu0  ;;  %3602 = vmatmul.mubr.bf16.gmra.mrb[24].mxu1 %v1432_v44 }
 0x54d   : > { %v1409_v22 = vadd.f32 %v5067_v12, %v1386_v51  ;;  %v1387_v62 = vmul.f32 %v4021_v7, %v3576_v61  ;;  %v1344_v63 = vpop.f32.mrb[31].mxu0 }
 0x54e   : > { %v1407_v2 = vadd.f32 %v5067_v12, %v1384_v56  ;;  %v1385_v3 = vmul.f32 %v4023_v20, %v1344_v63 }
 0x54f   : > { %v1410_v4 = vadd.f32 %v5067_v12, %v1387_v62  ;;  %v1425_v21 = vmax.f32 %v1409_v22, 0.0 }
 0x550   : > { %v1408_v6 = vadd.f32 %v5067_v12, %v1385_v3  ;;  %v1423_v8 = vmax.f32 %v1407_v2, 0.0 }
 0x551   : > { %v1426_v33 = vmax.f32 %v1410_v4, 0.0 }
 0x552   : > { %v1424_v40 = vmax.f32 %v1408_v6, 0.0 }
 0x553   : > { %v1434_v11 = vpack.c.bf16 %v1426_v33, %v1425_v21 }
 0x554   : > { %v1433_v15 = vpack.c.bf16 %v1424_v40, %v1423_v8 }
 0x556   : > { %3605 = vmatprep.mubr.bf16.mxu1 %v1433_v15 }
 0x557   : > { %3606 = vmatmul.mubr.bf16.gmra.mrb[28].mxu1 %v1434_v11 }
 0x5fe   : > { %v3595_v23 = vpop.f32.mrb[16].mxu1 }
 0x5ff   : > { %v1533_v24 = vpop.f32.mrb[17].mxu1 }
 0x600   : > { %v3596_v49 = vpop.f32.mrb[18].mxu1 }
 0x601   : > { %v1597_v38 = vpack.c.bf16 %v3596_v49, %v3595_v23  ;;  %v1536_v25 = vpop.f32.mrb[19].mxu1 }
 0x602   : > { %v1596_v43 = vpack.c.bf16 %v1536_v25, %v1533_v24 }
 0x604   : > { %3625 = vmatprep.mubr.bf16.mxu0 %v1596_v43  ;;  %3641 = vmatprep.subr.bf16.mxu1 %v1596_v43 }
 0x605   : > { %3626 = vmatmul.mubr.bf16.vlgmr.msra.gmra.mrb[32].mxu0 %v1597_v38  ;;  %3642 = vmatpush3.bf16.msra.mxu1 %v1596_v43 }
 0x606   : > { %3643 = vmatprep.subr.bf16.mxu1 %v1597_v38 }
 0x609   : > { %3644 = vmatpush3.bf16.msra.mxu1 %v1597_v38 }
 0x60f   : > { %v3599_v12 = vpop.f32.mrb[20].mxu1 }
 0x610   : > { %v1549_v29 = vpop.f32.mrb[21].mxu1 }
 0x611   : > { %v3600_v30 = vpop.f32.mrb[22].mxu1 }
 0x612   : > { %v1599_v52 = vpack.c.bf16 %v3600_v30, %v3599_v12  ;;  %v1552_v48 = vpop.f32.mrb[23].mxu1 }
 0x613   : > { %v1598_v37 = vpack.c.bf16 %v1552_v48, %v1549_v29 }
 0x615   : > { %3629 = vmatprep.mubr.bf16.mxu0 %v1598_v37  ;;  %3645 = vmatprep.subr.bf16.mxu1 %v1598_v37 }
 0x616   : > { %3630 = vmatmul.mubr.bf16.gmra.mrb[36].mxu0 %v1599_v52  ;;  %3646 = vmatpush3.bf16.msra.mxu1 %v1598_v37 }
 0x617   : > { %3647 = vmatprep.subr.bf16.mxu1 %v1599_v52 }
 0x61a   : > { %3648 = vmatpush3.bf16.msra.mxu1 %v1599_v52 }
 0x61f   : > { %v3603_v31 = vpop.f32.mrb[24].mxu1 }
 0x620   : > { %v1565_v57 = vpop.f32.mrb[25].mxu1 }
 0x621   : > { %v3604_v13 = vpop.f32.mrb[26].mxu1 }
 0x622   : > { %v1601_v34 = vpack.c.bf16 %v3604_v13, %v3603_v31  ;;  %v1568_v54 = vpop.f32.mrb[27].mxu1 }
 0x623   : > { %v1600_v36 = vpack.c.bf16 %v1568_v54, %v1565_v57 }
 0x625   : > { %3633 = vmatprep.mubr.bf16.mxu0 %v1600_v36  ;;  %3649 = vmatprep.subr.bf16.mxu1 %v1600_v36 }
 0x626   : > { %3634 = vmatmul.mubr.bf16.gmra.mrb[40].mxu0 %v1601_v34  ;;  %3650 = vmatpush3.bf16.msra.mxu1 %v1600_v36 }
 0x627   : > { %3651 = vmatprep.subr.bf16.mxu1 %v1601_v34 }
 0x62a   : > { %v3607_v14 = vpop.f32.mrb[28].mxu1  ;;  %3652 = vmatpush3.bf16.msra.mxu1 %v1601_v34 }
 0x62b   : > { %v1581_v10 = vpop.f32.mrb[29].mxu1 }
 0x62c   : > { %v3608_v41 = vpop.f32.mrb[30].mxu1 }
 0x62d   : > { %v1603_v60 = vpack.c.bf16 %v3608_v41, %v3607_v14  ;;  %v1584_v44 = vpop.f32.mrb[31].mxu1 }
 0x62e   : > { %v1602_v45 = vpack.c.bf16 %v1584_v44, %v1581_v10 }
 0x630   : > { %3637 = vmatprep.mubr.bf16.mxu0 %v1602_v45  ;;  %3653 = vmatprep.subr.bf16.mxu1 %v1602_v45 }
 0x631   : > { %3638 = vmatmul.mubr.bf16.gmra.mrb[44].mxu0 %v1603_v60  ;;  %3654 = vmatpush3.bf16.msra.mxu1 %v1602_v45 }
 0x632   : > { %3655 = vmatprep.subr.bf16.mxu1 %v1603_v60 }
 0x635   : > { %3656 = vmatpush3.bf16.msra.mxu1 %v1603_v60 }
 0x6d8   : > { %v3627_v17 = vpop.f32.mrb[32].mxu0 }
 0x6d9   : > { %1809 = vperm.xlu1 %3902, %v3627_v17   ;;  %v1702_v1 = vpop.f32.mrb[33].mxu0 }
 0x6da   : > { %v3628_v50 = vpop.f32.mrb[34].mxu0 }
 0x6db   : > { %v1705_v51 = vpop.f32.mrb[35].mxu0 }
 0x6dc   : > { %1804 = vperm.xlu0 %3903, %v1705_v51  }
 0x6dd   : > { %1799 = vperm.xlu1 %3902, %v1702_v1  }
 0x6e1   : > { %1814 = vperm.xlu1 %3902, %v3628_v50  }
 0x6e9   : > { %v3631_v16 = vpop.f32.mrb[36].mxu0 }
 0x6ea   : > { %1829 = vperm.xlu0 %3903, %v3631_v16   ;;  %v1718_v7 = vpop.f32.mrb[37].mxu0 }
 0x6eb   : > { %v3632_v56 = vpop.f32.mrb[38].mxu0 }
 0x6ec   : > { %v1721_v61 = vpop.f32.mrb[39].mxu0 }
 0x6ed   : > { %1824 = vperm.xlu1 %3902, %v1721_v61  }
 0x6ee   : > { %1819 = vperm.xlu0 %3903, %v1718_v7  }
 0x6f1   : > { %1834 = vperm.xlu1 %3902, %v3632_v56  }
 0x6f9   : > { %v3635_v20 = vpop.f32.mrb[40].mxu0 }
 0x6fa   : > { %1849 = vperm.xlu0 %3903, %v3635_v20   ;;  %v1734_v22 = vpop.f32.mrb[41].mxu0 }
 0x6fb   : > { %v3636_v62 = vpop.f32.mrb[42].mxu0 }
 0x6fc   : > { %v1737_v63 = vpop.f32.mrb[43].mxu0 }
 0x6fd   : > { %1844 = vperm.xlu1 %3902, %v1737_v63  }
 0x6fe   : > { %1839 = vperm.xlu0 %3903, %v1734_v22  }
 0x701   : > { %1854 = vperm.xlu1 %3902, %v3636_v62  }
 0x704   : > { %v3639_v2 = vpop.f32.mrb[44].mxu0 }
 0x705   : > { %1869 = vperm.xlu0 %3903, %v3639_v2   ;;  %v1750_v3 = vpop.f32.mrb[45].mxu0 }
 0x706   : > { %v3640_v4 = vpop.f32.mrb[46].mxu0 }
 0x707   : > { %v1753_v6 = vpop.f32.mrb[47].mxu0 }
 0x708   : > { %1864 = vperm.xlu1 %3902, %v1753_v6  }
 0x709   : > { %1859 = vperm.xlu0 %3903, %v1750_v3  }
 0x70c   : > { %1874 = vperm.xlu1 %3902, %v3640_v4  }
 0x727   : > { %1765 = vxpose.xlu0.b32.start [1/16] (narrow) %v1702_v1, 8 }
 0x72b   : > { %1766 = vxpose.xlu0.b32.cont [2/16] (narrow) %v1705_v51, 8 }
 0x72f   : > { %1767 = vxpose.xlu0.b32.cont [3/16] (narrow) %v3627_v17, 8 }
 0x733   : > { %1768 = vxpose.xlu0.b32.cont [4/16] (narrow) %v3628_v50, 8 }
 0x737   : > { %1769 = vxpose.xlu0.b32.cont [5/16] (narrow) %v1718_v7, 8 }
 0x73b   : > { %1770 = vxpose.xlu0.b32.cont [6/16] (narrow) %v1721_v61, 8 }
 0x73f   : > { %1771 = vxpose.xlu0.b32.cont [7/16] (narrow) %v3631_v16, 8 }
 0x743   : > { %1772 = vxpose.xlu0.b32.cont [8/16] (narrow) %v3632_v56, 8 }
 0x747   : > { %1773 = vxpose.xlu0.b32.cont [9/16] (narrow) %v1734_v22, 8 }
 0x74b   : > { %1774 = vxpose.xlu0.b32.cont [10/16] (narrow) %v1737_v63, 8 }
 0x74f   : > { %1775 = vxpose.xlu0.b32.cont [11/16] (narrow) %v3635_v20, 8 }
 0x753   : > { %1776 = vxpose.xlu0.b32.cont [12/16] (narrow) %v3636_v62, 8 }
 0x757   : > { %1777 = vxpose.xlu0.b32.cont [13/16] (narrow) %v1750_v3, 8 }
 0x758   : > { %v1810_v21 = vpop.permute.xlu1 %1809 }
 0x75b   : > { %1778 = vxpose.xlu0.b32.cont [14/16] (narrow) %v1753_v6, 8  ;;  %v1805_v33 = vpop.permute.xlu0 %1804 }
 0x75c   : > { %v1800_v8 = vpop.permute.xlu1 %1799 }
 0x75f   : > { %1779 = vxpose.xlu0.b32.cont [15/16] (narrow) %v3639_v2, 8 }
 0x760   : > { %v1815_v11 = vpop.permute.xlu1 %1814 }
 0x763   : > { %1780 = vxpose.xlu0.b32.end [16/16] (narrow) %v3640_v4, 8 }
 0x769   : > { %v1830_v40 = vpop.permute.xlu0 %1829 }
 0x76c   : > { %v1825_v15 = vpop.permute.xlu1 %1824 }
 0x76d   : > { %v1820_v9 = vpop.permute.xlu0 %1819 }
 0x770   : > { %v1835_v24 = vpop.permute.xlu1 %1834 }
 0x779   : > { %v1850_v23 = vpop.permute.xlu0 %1849 }
 0x77c   : > { %v5085_v49 = vpop.permute.xlu1 %1844 }
 0x77d   : > { %v1840_v38 = vpop.permute.xlu0 %1839 }
 0x780   : > { %v1855_v43 = vpop.permute.xlu1 %1854 }
 0x784   : > { %v5087_v25 = vpop.permute.xlu0 %1869 }
 0x787   : > { %v5089_v12 = vpop.permute.xlu1 %1864 }
 0x788   : > { %v5091_v29 = vpop.permute.xlu0 %1859 }
 0x78b   : > { %v1875_v48 = vpop.permute.xlu1 %1874 }
 0x7a7   : > { %v1781_v30 = vpop.trf.xlu0 }
 0x7a8   : > { %v5094_v52 = vrot.slane %v1781_v30, %v4912_v18 }
 0x7aa   : > { %v1881_v37 = vadd.f32 %v5094_v52, %v1800_v8  ;;  %v1896_v31 = vadd.f32 %v5094_v52, %v1875_v48  ;;  %v1882_v57 = vadd.f32 %v5094_v52, %v1805_v33  ;;  %v1883_v36 = vadd.f32 %v5094_v52, %v1810_v21 }
 0x7ab   : > { %v1884_v41 = vadd.f32 %v5094_v52, %v1815_v11  ;;  %v1887_v16 = vadd.f32 %v5094_v52, %v1830_v40  ;;  %v1885_v20 = vadd.f32 %v5094_v52, %v1820_v9  ;;  %v1888_v2 = vadd.f32 %v5094_v52, %v1835_v24 }
 0x7ac   : > { %v1897_v13 = vmul.f32 0.2, %v1881_v37  ;;  %v1912_v34 = vmul.f32 0.2, %v1896_v31  ;;  %v1898_v54 = vmul.f32 0.2, %v1882_v57  ;;  %v1886_v21 = vadd.f32 %v5094_v52, %v1825_v15 }
 0x7ad   : > { %v1899_v17 = vmul.f32 0.2, %v1883_v36  ;;  %v1900_v51 = vmul.f32 0.2, %v1884_v41  ;;  %v1903_v61 = vmul.f32 0.2, %v1887_v16  ;;  %v1891_v11 = vadd.f32 %v5094_v52, %v1850_v23 }
 0x7ae   : > { %v1913_v14 = vmax.f32 %v1881_v37, %v1897_v13  ;;  %v1928_v10 = vmax.f32 %v1896_v31, %v1912_v34  ;;  %v1914_v45 = vmax.f32 %v1882_v57, %v1898_v54  ;;  %v1901_v63 = vmul.f32 0.2, %v1885_v20 }
 0x7af   : > { %v1915_v50 = vmax.f32 %v1883_v36, %v1899_v17  ;;  %v1916_v56 = vmax.f32 %v1884_v41, %v1900_v51  ;;  %v1919_v62 = vmax.f32 %v1887_v16, %v1903_v61  ;;  %v1904_v6 = vmul.f32 0.2, %v1888_v2 }
 0x7b0   : > { %v5102_v60 = vadd.f32 %v4927_v28, %v1913_v14  ;;  %v5105_v44 = vadd.f32 %v4925_v27, %v1928_v10  ;;  %v5110_v1 = vadd.f32 %v4930_v35, %v1914_v45  ;;  %v1917_v4 = vmax.f32 %v1885_v20, %v1901_v63 }
 0x7b1   : > { %v5115_v7 = vadd.f32 %v4942_v42, %v1915_v50  ;;  %v5120_v22 = vadd.f32 %v4949_v47, %v1916_v56  ;;  %v5125_v3 = vadd.f32 %v4957_v53, %v1919_v62  ;;  %v1920_v8 = vmax.f32 %v1888_v2, %v1904_v6 }
 0x7b2   : > { %1945 = vmax.xlane.f32.xlu1 %v5102_v60  ;;  %1975 = vmax.xlane.f32.xlu0 %v5105_v44  ;;  %v5130_v33 = vadd.f32 %v4965_v59, %v1917_v4  ;;  %v1902_v40 = vmul.f32 0.2, %v1886_v21  ;;  %v1907_v30 = vmul.f32 0.2, %v1891_v11  ;;  %v1889_v48 = vadd.f32 %v5094_v52, %v1840_v38 }
 0x7b3   : > { %v5135_v9 = vadd.f32 %v4972_v0, %v1920_v8  ;;  %v1892_v57 = vadd.f32 %v5094_v52, %v1855_v43  ;;  %v1890_v54 = vadd.f32 %v5094_v52, %v5085_v49  ;;  %v1893_v43 = vadd.f32 %v5094_v52, %v5091_v29 }
 0x7b4   : > { %v1918_v24 = vmax.f32 %v1886_v21, %v1902_v40  ;;  %v1923_v37 = vmax.f32 %v1891_v11, %v1907_v30  ;;  %v1905_v31 = vmul.f32 0.2, %v1889_v48  ;;  %v1894_v49 = vadd.f32 %v5094_v52, %v5089_v12 }
 0x7b5   : > { %v1908_v34 = vmul.f32 0.2, %v1892_v57  ;;  %v1906_v14 = vmul.f32 0.2, %v1890_v54  ;;  %v1909_v45 = vmul.f32 0.2, %v1893_v43  ;;  %v1895_v29 = vadd.f32 %v5094_v52, %v5087_v25 }
 0x7b6   : > { %1947 = vmax.xlane.f32.xlu1 %v5110_v1  ;;  %v5140_v15 = vadd.f32 %v4980_v5, %v1918_v24  ;;  %v5145_v23 = vadd.f32 %v4989_v19, %v1923_v37  ;;  %v1921_v13 = vmax.f32 %v1889_v48, %v1905_v31  ;;  %v1910_v51 = vmul.f32 0.2, %v1894_v49 }
 0x7b7   : > { %v1924_v36 = vmax.f32 %v1892_v57, %v1908_v34  ;;  %v1922_v41 = vmax.f32 %v1890_v54, %v1906_v14  ;;  %v1925_v50 = vmax.f32 %v1893_v43, %v1909_v45  ;;  %v1911_v61 = vmul.f32 0.2, %v1895_v29 }
 0x7b8   : > { %v5151_v38 = vadd.f32 %v4998_v26, %v1921_v13  ;;  %v1926_v56 = vmax.f32 %v1894_v49, %v1910_v51 }
 0x7b9   : > { %v5157_v10 = vadd.f32 %v5006_v32, %v1924_v36  ;;  %v5163_v17 = vadd.f32 %v5014_v39, %v1922_v41  ;;  %v5169_v16 = vadd.f32 %v5023_v46, %v1925_v50  ;;  %v1927_v20 = vmax.f32 %v1895_v29, %v1911_v61 }
 0x7ba   : > { %1949 = vmax.xlane.f32.xlu1 %v5115_v7  ;;  %v5173_v12 = vadd.f32 %v5034_v55, %v1926_v56 }
 0x7bb   : > { %v5177_v62 = vadd.f32 %v5041_v58, %v1927_v20 }
 0x7be   : > { %1951 = vmax.xlane.f32.xlu1 %v5120_v22 }
 0x7c2   : > { %1957 = vmax.xlane.f32.xlu1 %v5125_v3 }
 0x7c6   : > { %1953 = vmax.xlane.f32.xlu1 %v5130_v33 }
 0x7ca   : > { %1959 = vmax.xlane.f32.xlu1 %v5135_v9 }
 0x7ce   : > { %1955 = vmax.xlane.f32.xlu1 %v5140_v15 }
 0x7d2   : > { %1965 = vmax.xlane.f32.xlu1 %v5145_v23 }
 0x7d6   : > { %1961 = vmax.xlane.f32.xlu1 %v5151_v38 }
 0x7da   : > { %1967 = vmax.xlane.f32.xlu1 %v5157_v10 }
 0x7de   : > { %1963 = vmax.xlane.f32.xlu1 %v5163_v17 }
 0x7e2   : > { %1969 = vmax.xlane.f32.xlu1 %v5169_v16 }
 0x7e6   : > { %1971 = vmax.xlane.f32.xlu1 %v5173_v12 }
 0x7ea   : > { %1973 = vmax.xlane.f32.xlu1 %v5177_v62 }
 0x83f   : > { %v1946_v25 = vpop.xlane.xlu1 %1945 }
 0x840   : > { %v1977_v52 = vsub.f32 %v5102_v60, %v1946_v25 }
 0x842   : > { %v1993_v63 = vmul.f32 1.442695, %v1977_v52 }
 0x843   : > { %v1948_v2 = vpop.xlane.xlu1 %1947 }
 0x844   : > { %v1978_v4 = vsub.f32 %v5110_v1, %v1948_v2  ;;  %4024 = vpow2.f32 %v1993_v63 }
 0x846   : > { %v1995_v6 = vmul.f32 1.442695, %v1978_v4 }
 0x847   : > { %v1950_v21 = vpop.xlane.xlu1 %1949 }
 0x848   : > { %4026 = vpow2.f32 %v1995_v6  ;;  %v1979_v8 = vsub.f32 %v5115_v7, %v1950_v21 }
 0x84a   : > { %v1997_v40 = vmul.f32 1.442695, %v1979_v8 }
 0x84b   : > { %v1952_v11 = vpop.xlane.xlu1 %1951 }
 0x84c   : > { %4028 = vpow2.f32 %v1997_v40  ;;  %v1980_v24 = vsub.f32 %v5120_v22, %v1952_v11  ;;  %v1976_v11 = vpop.xlane.xlu0 %1975 }
 0x84e   : > { %v1999_v30 = vmul.f32 1.442695, %v1980_v24  ;;  %v4025_v48 = vpop.eup %4024  ;;  %v1992_v24 = vsub.f32 %v5105_v44, %v1976_v11  ;;  %v5199_v11 = vld [vmem:[%s5471_s12] ss:$0 sm:$0xff] }
 0x84f   : > { %v1958_v37 = vpop.xlane.xlu1 %1957  ;;  %2025 = vadd.xlane.f32.xlu1 %v4025_v48 }
 0x850   : > { %4030 = vpow2.f32 %v1999_v30  ;;  %v1983_v60 = vsub.f32 %v5125_v3, %v1958_v37 }
 0x852   : > { %v4027_v31 = vpop.eup %4026  ;;  %v2005_v1 = vmul.f32 1.442695, %v1983_v60 }
 0x853   : > { %v1954_v57 = vpop.xlane.xlu1 %1953  ;;  %v2057_v13 = vpack.c.bf16 %v4027_v31, %v4025_v48  ;;  %2027 = vadd.xlane.f32.xlu1 %v4027_v31  ;;  %v2023_v31 = vmul.f32 1.442695, %v1992_v24 }
 0x854   : > { %4032 = vpow2.f32 %v2005_v1  ;;  %v1981_v7 = vsub.f32 %v5130_v33, %v1954_v57 }
 0x855   : > { %3657 = vmatprep.mubr.bf16.mxu1 %v2057_v13 }
 0x856   : > { %v4029_v34 = vpop.eup %4028  ;;  %v2001_v54 = vmul.f32 1.442695, %v1981_v7 }
 0x857   : > { %v1960_v36 = vpop.xlane.xlu1 %1959  ;;  %2029 = vadd.xlane.f32.xlu1 %v4029_v34 }
 0x858   : > { %4034 = vpow2.f32 %v2001_v54  ;;  %v1984_v22 = vsub.f32 %v5135_v9, %v1960_v36 }
 0x85a   : > { %v4031_v14 = vpop.eup %4030  ;;  %v2007_v43 = vmul.f32 1.442695, %v1984_v22 }
 0x85b   : > { %v1956_v41 = vpop.xlane.xlu1 %1955  ;;  %v2058_v3 = vpack.c.bf16 %v4031_v14, %v4029_v34  ;;  %2031 = vadd.xlane.f32.xlu1 %v4031_v14 }
 0x85c   : > { %4036 = vpow2.f32 %v2007_v43  ;;  %v1982_v45 = vsub.f32 %v5140_v15, %v1956_v41  ;;  %v3944_v43 = vld [vmem:[#allocation13] sm:$0xff]   ;;  %v3945_v41 = vld [vmem:[#allocation13 + $0x8] sm:$0xff]  }
 0x85d   : > { %3658 = vmatmul.mubr.bf16.vlgmr.msra.gmra.mrb[32].mxu1 %v2058_v3  ;;  %3673 = vmatprep.subr.bf16.mxu0 %v3944_v43  ;;  %v3946_v3 = vld [vmem:[#allocation13 + $0x10] sm:$0xff]  }
 0x85e   : > { %v4033_v49 = vpop.eup %4032  ;;  %v2003_v50 = vmul.f32 1.442695, %v1982_v45  ;;  %3674 = vmatpush3.bf16.msra.mxu0 %v3944_v43  ;;  %v3947_v45 = vld [vmem:[#allocation13 + $0x18] sm:$0xff]  }
 0x85f   : > { %v1966_v33 = vpop.xlane.xlu1 %1965  ;;  %2037 = vadd.xlane.f32.xlu1 %v4033_v49  ;;  %3675 = vmatprep.subr.bf16.mxu0 %v3945_v41 }
 0x860   : > { %4038 = vpow2.f32 %v2003_v50  ;;  %v1987_v15 = vsub.f32 %v5145_v23, %v1966_v33  ;;  %v3949_v50 = vld [vmem:[#allocation13 + $0x28] sm:$0xff]   ;;  %v3950_v33 = vld [vmem:[#allocation13 + $0x30] sm:$0xff]  }
 0x862   : > { %v4035_v51 = vpop.eup %4034  ;;  %v2013_v8 = vmul.f32 1.442695, %v1987_v15  ;;  %3676 = vmatpush3.bf16.msra.mxu0 %v3945_v41  ;;  %v3958_v15 = vld [vmem:[#allocation14 + $0x30] sm:$0xff]  }
 0x863   : > { %v1962_v29 = vpop.xlane.xlu1 %1961  ;;  %2033 = vadd.xlane.f32.xlu1 %v4035_v51  ;;  %3677 = vmatprep.subr.bf16.mxu0 %v3946_v3 }
 0x864   : > { %v1985_v56 = vsub.f32 %v5151_v38, %v1962_v29  ;;  %v3952_v29 = vld [vmem:[#allocation14] sm:$0xff]  }
 0x865   : > { %3705 = vmatprep.subr.bf16.mxu1 %v3952_v29 }
 0x866   : > { %v4037_v9 = vpop.eup %4036  ;;  %v2009_v61 = vmul.f32 1.442695, %v1985_v56  ;;  %3678 = vmatpush3.bf16.msra.mxu0 %v3946_v3  ;;  %v3953_v56 = vld [vmem:[#allocation14 + $0x8] sm:$0xff]   ;;  %3706 = vmatpush3.bf16.msra.mxu1 %v3952_v29 }
 0x867   : > { %v1968_v20 = vpop.xlane.xlu1 %1967  ;;  %2039 = vadd.xlane.f32.xlu1 %v4037_v9  ;;  %v2060_v21 = vpack.c.bf16 %v4037_v9, %v4033_v49  ;;  %3679 = vmatprep.subr.bf16.mxu0 %v3947_v45  ;;  %v3948_v49 = vld [vmem:[#allocation13 + $0x20] sm:$0xff]   ;;  %v3954_v9 = vld [vmem:[#allocation14 + $0x10] sm:$0xff]  }
 0x868   : > { %4040 = vpow2.f32 %v2009_v61  ;;  %v1988_v25 = vsub.f32 %v5157_v10, %v1968_v20  ;;  %3707 = vmatprep.subr.bf16.mxu1 %v3953_v56  ;;  %v3955_v61 = vld [vmem:[#allocation14 + $0x18] sm:$0xff]   ;;  %v3956_v20 = vld [vmem:[#allocation14 + $0x20] sm:$0xff]  }
 0x86a   : > { %v4039_v52 = vpop.eup %4038  ;;  %v2015_v63 = vmul.f32 1.442695, %v1988_v25  ;;  %3680 = vmatpush3.bf16.msra.mxu0 %v3947_v45  ;;  %3708 = vmatpush3.bf16.msra.mxu1 %v3953_v56  ;;  %v3957_v25 = vld [vmem:[#allocation14 + $0x28] sm:$0xff]  }
 0x86b   : > { %v1964_v2 = vpop.xlane.xlu1 %1963  ;;  %v2059_v4 = vpack.c.bf16 %v4039_v52, %v4035_v51  ;;  %2035 = vadd.xlane.f32.xlu1 %v4039_v52  ;;  %3681 = vmatprep.subr.bf16.mxu0 %v3948_v49  ;;  %v3951_v51 = vld [vmem:[#allocation13 + $0x38] sm:$0xff]  }
 0x86c   : > { %4042 = vpow2.f32 %v2015_v63  ;;  %v1986_v6 = vsub.f32 %v5163_v17, %v1964_v2  ;;  %3709 = vmatprep.subr.bf16.mxu1 %v3954_v9 }
 0x86d   : > { %3661 = vmatprep.mubr.bf16.mxu1 %v2059_v4 }
 0x86e   : > { %v2011_v38 = vmul.f32 1.442695, %v1986_v6  ;;  %3662 = vmatmul.mubr.bf16.gmra.mrb[36].mxu1 %v2060_v21  ;;  %3682 = vmatpush3.bf16.msra.mxu0 %v3948_v49 }
 0x86f   : > { %v1970_v40 = vpop.xlane.xlu1 %1969  ;;  %3683 = vmatprep.subr.bf16.mxu0 %v3949_v50  ;;  %3710 = vmatpush3.bf16.msra.mxu1 %v3954_v9 }
 0x870   : > { %4044 = vpow2.f32 %v2011_v38  ;;  %v1989_v10 = vsub.f32 %v5169_v16, %v1970_v40  ;;  %3711 = vmatprep.subr.bf16.mxu1 %v3955_v61 }
 0x871   : > { %4046 = vpow2.f32 %v2013_v8 }
 0x872   : > { %v4041_v23 = vpop.eup %4040  ;;  %v2017_v30 = vmul.f32 1.442695, %v1989_v10  ;;  %3684 = vmatpush3.bf16.msra.mxu0 %v3949_v50 }
 0x873   : > { %2041 = vadd.xlane.f32.xlu1 %v4041_v23  ;;  %v1972_v48 = vpop.xlane.xlu1 %1971  ;;  %3685 = vmatprep.subr.bf16.mxu0 %v3950_v33 }
 0x874   : > { %v1990_v37 = vsub.f32 %v5173_v12, %v1972_v48  ;;  %4048 = vpow2.f32 %v2017_v30  ;;  %3712 = vmatpush3.bf16.msra.mxu1 %v3955_v61 }
 0x875   : > { %3713 = vmatprep.subr.bf16.mxu1 %v3956_v20 }
 0x876   : > { %v4043_v17 = vpop.eup %4042  ;;  %v2019_v60 = vmul.f32 1.442695, %v1990_v37  ;;  %3686 = vmatpush3.bf16.msra.mxu0 %v3950_v33 }
 0x877   : > { %2047 = vadd.xlane.f32.xlu0 %v4043_v17  ;;  %v1974_v1 = vpop.xlane.xlu1 %1973  ;;  %3687 = vmatprep.subr.bf16.mxu0 %v3951_v51 }
 0x878   : > { %4050 = vpow2.f32 %v2019_v60  ;;  %v1991_v57 = vsub.f32 %v5177_v62, %v1974_v1  ;;  %3714 = vmatpush3.bf16.msra.mxu1 %v3956_v20 }
 0x879   : > { %4052 = vpow2.f32 %v2023_v31  ;;  %3715 = vmatprep.subr.bf16.mxu1 %v3957_v25 }
 0x87a   : > { %v4045_v13 = vpop.eup %4044  ;;  %v2021_v16 = vmul.f32 1.442695, %v1991_v57  ;;  %3688 = vmatpush3.bf16.msra.mxu0 %v3951_v51 }
 0x87b   : > { %v4047_v7 = vpop.eup %4046  ;;  %2043 = vadd.xlane.f32.xlu1 %v4045_v13  ;;  %v2061_v44 = vpack.c.bf16 %v4045_v13, %v4041_v23 }
 0x87c   : > { %4054 = vpow2.f32 %v2021_v16  ;;  %v2062_v34 = vpack.c.bf16 %v4043_v17, %v4047_v7  ;;  %3716 = vmatpush3.bf16.msra.mxu1 %v3957_v25 }
 0x87d   : > { %3665 = vmatprep.mubr.bf16.mxu1 %v2061_v44  ;;  %3717 = vmatprep.subr.bf16.mxu1 %v3958_v15 }
 0x87e   : > { %3666 = vmatmul.mubr.bf16.gmra.mrb[40].mxu1 %v2062_v34  ;;  %v4049_v12 = vpop.eup %4048 }
 0x87f   : > { %2045 = vadd.xlane.f32.xlu1 %v4047_v7 }
 0x880   : > { %3718 = vmatpush3.bf16.msra.mxu1 %v3958_v15 }
 0x882   : > { %v4051_v54 = vpop.eup %4050 }
 0x883   : > { %2049 = vadd.xlane.f32.xlu1 %v4049_v12  ;;  %2051 = vadd.xlane.f32.xlu0 %v4051_v54  ;;  %v2063_v36 = vpack.c.bf16 %v4051_v54, %v4049_v12  ;;  %v4053_v22 = vpop.eup %4052 }
 0x885   : > { %3669 = vmatprep.mubr.bf16.mxu1 %v2063_v36 }
 0x886   : > { %v4055_v14 = vpop.eup %4054 }
 0x887   : > { %2055 = vadd.xlane.f32.xlu0 %v4053_v22  ;;  %2053 = vadd.xlane.f32.xlu1 %v4055_v14  ;;  %v2064_v62 = vpack.c.bf16 %v4053_v22, %v4055_v14 }
 0x889   : > { %3670 = vmatmul.mubr.bf16.gmra.mrb[44].mxu1 %v2064_v62 }
 0x8dc   : > { %v2026_v52 = vpop.xlane.xlu1 %2025 }
 0x8e0   : > { %v2028_v63 = vpop.xlane.xlu1 %2027 }
 0x8e4   : > { %v2030_v2 = vpop.xlane.xlu1 %2029 }
 0x8e5   : > { %4056 = vrcp.f32 %v2030_v2 }
 0x8e6   : > { %4058 = vrcp.f32 %v2026_v52 }
 0x8e8   : > { %v2032_v4 = vpop.xlane.xlu1 %2031 }
 0x8e9   : > { %4060 = vrcp.f32 %v2032_v4 }
 0x8ea   : > { %4062 = vrcp.f32 %v2028_v63 }
 0x8ec   : > { %v2038_v6 = vpop.xlane.xlu1 %2037 }
 0x8ed   : > { %4064 = vrcp.f32 %v2038_v6 }
 0x8ef   : > { %v4057_v38 = vpop.eup %4056 }
 0x8f0   : > { %v2034_v21 = vpop.xlane.xlu1 %2033  ;;  %v4059_v10 = vpop.eup %4058 }
 0x8f1   : > { %4066 = vrcp.f32 %v2034_v21 }
 0x8f3   : > { %v4061_v30 = vpop.eup %4060 }
 0x8f4   : > { %v2040_v8 = vpop.xlane.xlu1 %2039  ;;  %v4063_v17 = vpop.eup %4062 }
 0x8f5   : > { %4068 = vrcp.f32 %v2040_v8 }
 0x8f7   : > { %v4065_v41 = vpop.eup %4064 }
 0x8f8   : > { %v2036_v16 = vpop.xlane.xlu1 %2035 }
 0x8f9   : > { %4070 = vrcp.f32 %v2036_v16 }
 0x8fb   : > { %v4067_v45 = vpop.eup %4066 }
 0x8ff   : > { %v4069_v33 = vpop.eup %4068 }
 0x900   : > { %v2042_v22 = vpop.xlane.xlu1 %2041 }
 0x903   : > { %v4071_v9 = vpop.eup %4070 }
 0x904   : > { %v2048_v63 = vpop.xlane.xlu0 %2047 }
 0x908   : > { %v2044_v43 = vpop.xlane.xlu1 %2043 }
 0x90c   : > { %v2046_v51 = vpop.xlane.xlu1 %2045 }
 0x90d   : > { %4072 = vrcp.f32 %v2046_v51 }
 0x90e   : > { %4074 = vrcp.f32 %v2042_v22 }
 0x90f   : > { %4076 = vrcp.f32 %v2048_v63 }
 0x910   : > { %v2050_v8 = vpop.xlane.xlu1 %2049  ;;  %4078 = vrcp.f32 %v2044_v43 }
 0x930   : > { %v3659_v40 = vpop.f32.mrb[32].mxu1 }
 0x931   : > { %v2180_v23 = vmul.f32 %v4057_v38, %v3659_v40  ;;  %v2099_v24 = vpop.f32.mrb[33].mxu1 }
 0x932   : > { %v2178_v48 = vmul.f32 %v4059_v10, %v2099_v24  ;;  %v3660_v37 = vpop.f32.mrb[34].mxu1 }
 0x933   : > { %v2203_v60 = vadd.f32 %v5199_v11, %v2180_v23  ;;  %v2181_v31 = vmul.f32 %v4061_v30, %v3660_v37  ;;  %v2102_v1 = vpop.f32.mrb[35].mxu1  ;;  %v2052_v23 = vpop.xlane.xlu0 %2051 }
 0x934   : > { %v2201_v57 = vadd.f32 %v5199_v11, %v2178_v48  ;;  %v2179_v13 = vmul.f32 %v4063_v17, %v2102_v1  ;;  %v2054_v30 = vpop.xlane.xlu1 %2053  ;;  %v4073_v48 = vpop.eup %4072 }
 0x935   : > { %v2204_v7 = vadd.f32 %v5199_v11, %v2181_v31  ;;  %v2219_v34 = vmax.f32 %v2203_v60, 0.0  ;;  %v4075_v60 = vpop.eup %4074  ;;  %4080 = vrcp.f32 %v2054_v30  ;;  %v3959_v30 = vld [vmem:[#allocation14 + $0x38] sm:$0xff]  }
 0x936   : > { %v2202_v44 = vadd.f32 %v5199_v11, %v2179_v13  ;;  %v2217_v54 = vmax.f32 %v2201_v57, 0.0  ;;  %v4077_v57 = vpop.eup %4076  ;;  %4082 = vrcp.f32 %v2050_v8  ;;  %3719 = vmatprep.subr.bf16.mxu1 %v3959_v30 }
 0x937   : > { %v2220_v12 = vmax.f32 %v2204_v7, 0.0  ;;  %v2056_v37 = vpop.xlane.xlu0 %2055  ;;  %v4079_v7 = vpop.eup %4078  ;;  %3720 = vmatpush3.bf16.msra.mxu1 %v3959_v30 }
 0x938   : > { %v2218_v36 = vmax.f32 %v2202_v44, 0.0  ;;  %4084 = vrcp.f32 %v2056_v37 }
 0x939   : > { %v2234_v14 = vpack.c.bf16 %v2220_v12, %v2219_v34  ;;  %4086 = vrcp.f32 %v2052_v23 }
 0x93a   : > { %v2233_v62 = vpack.c.bf16 %v2218_v36, %v2217_v54 }
 0x93c   : > { %3689 = vmatprep.mubr.bf16.mxu0 %v2233_v62 }
 0x93d   : > { %3690 = vmatmul.mubr.bf16.vlgmr.msra.gmra.mrb[48].mxu0 %v2234_v14 }
 0x941   : > { %v3663_v3 = vpop.f32.mrb[36].mxu1 }
 0x942   : > { %v2184_v49 = vmul.f32 %v4065_v41, %v3663_v3  ;;  %v2115_v50 = vpop.f32.mrb[37].mxu1 }
 0x943   : > { %v2182_v29 = vmul.f32 %v4067_v45, %v2115_v50  ;;  %v3664_v56 = vpop.f32.mrb[38].mxu1  ;;  %v4081_v50 = vpop.eup %4080 }
 0x944   : > { %v2207_v61 = vadd.f32 %v5199_v11, %v2184_v49  ;;  %v2185_v20 = vmul.f32 %v4069_v33, %v3664_v56  ;;  %v2118_v25 = vpop.f32.mrb[39].mxu1  ;;  %v4083_v51 = vpop.eup %4082 }
 0x945   : > { %v2205_v15 = vadd.f32 %v5199_v11, %v2182_v29  ;;  %v2183_v52 = vmul.f32 %v4071_v9, %v2118_v25  ;;  %v4085_v9 = vpop.eup %4084 }
 0x946   : > { %v2208_v2 = vadd.f32 %v5199_v11, %v2185_v20  ;;  %v2223_v6 = vmax.f32 %v2207_v61, 0.0  ;;  %v4087_v25 = vpop.eup %4086 }
 0x947   : > { %v2206_v4 = vadd.f32 %v5199_v11, %v2183_v52  ;;  %v2221_v38 = vmax.f32 %v2205_v15, 0.0 }
 0x948   : > { %v2224_v21 = vmax.f32 %v2208_v2, 0.0 }
 0x949   : > { %v2222_v40 = vmax.f32 %v2206_v4, 0.0 }
 0x94a   : > { %v2236_v10 = vpack.c.bf16 %v2224_v21, %v2223_v6 }
 0x94b   : > { %v2235_v24 = vpack.c.bf16 %v2222_v40, %v2221_v38 }
 0x94d   : > { %3693 = vmatprep.mubr.bf16.mxu0 %v2235_v24 }
 0x94e   : > { %3694 = vmatmul.mubr.bf16.gmra.mrb[52].mxu0 %v2236_v10 }
 0x951   : > { %v3667_v17 = vpop.f32.mrb[40].mxu1 }
 0x952   : > { %v2188_v31 = vmul.f32 %v4073_v48, %v3667_v17  ;;  %v2131_v1 = vpop.f32.mrb[41].mxu1 }
 0x953   : > { %v2186_v13 = vmul.f32 %v4075_v60, %v2131_v1  ;;  %v3668_v16 = vpop.f32.mrb[42].mxu1 }
 0x954   : > { %v2211_v44 = vadd.f32 %v5199_v11, %v2188_v31  ;;  %v2189_v34 = vmul.f32 %v4077_v57, %v3668_v16  ;;  %v2134_v12 = vpop.f32.mrb[43].mxu1 }
 0x955   : > { %v2209_v54 = vadd.f32 %v5199_v11, %v2186_v13  ;;  %v2187_v36 = vmul.f32 %v4079_v7, %v2134_v12 }
 0x956   : > { %v2212_v22 = vadd.f32 %v5199_v11, %v2189_v34  ;;  %v2227_v62 = vmax.f32 %v2211_v44, 0.0 }
 0x957   : > { %v2210_v14 = vadd.f32 %v5199_v11, %v2187_v36  ;;  %v2225_v41 = vmax.f32 %v2209_v54, 0.0 }
 0x958   : > { %v2228_v43 = vmax.f32 %v2212_v22, 0.0 }
 0x959   : > { %v2226_v3 = vmax.f32 %v2210_v14, 0.0 }
 0x95a   : > { %v2238_v45 = vpack.c.bf16 %v2228_v43, %v2227_v62 }
 0x95b   : > { %v2237_v49 = vpack.c.bf16 %v2226_v3, %v2225_v41 }
 0x95c   : > { %v3671_v33 = vpop.f32.mrb[44].mxu1 }
 0x95d   : > { %v2192_v29 = vmul.f32 %v4081_v50, %v3671_v33  ;;  %v2147_v56 = vpop.f32.mrb[45].mxu1  ;;  %3697 = vmatprep.mubr.bf16.mxu0 %v2237_v49 }
 0x95e   : > { %v2190_v61 = vmul.f32 %v4083_v51, %v2147_v56  ;;  %v3672_v20 = vpop.f32.mrb[46].mxu1  ;;  %3698 = vmatmul.mubr.bf16.gmra.mrb[56].mxu0 %v2238_v45 }
 0x95f   : > { %v2215_v15 = vadd.f32 %v5199_v11, %v2192_v29  ;;  %v2193_v52 = vmul.f32 %v4085_v9, %v3672_v20  ;;  %v2150_v63 = vpop.f32.mrb[47].mxu1 }
 0x960   : > { %v2213_v2 = vadd.f32 %v5199_v11, %v2190_v61  ;;  %v2191_v4 = vmul.f32 %v4087_v25, %v2150_v63 }
 0x961   : > { %v2216_v6 = vadd.f32 %v5199_v11, %v2193_v52  ;;  %v2231_v8 = vmax.f32 %v2215_v15, 0.0 }
 0x962   : > { %v2214_v21 = vadd.f32 %v5199_v11, %v2191_v4  ;;  %v2229_v40 = vmax.f32 %v2213_v2, 0.0 }
 0x963   : > { %v2232_v38 = vmax.f32 %v2216_v6, 0.0 }
 0x964   : > { %v2230_v10 = vmax.f32 %v2214_v21, 0.0 }
 0x965   : > { %v2240_v23 = vpack.c.bf16 %v2232_v38, %v2231_v8 }
 0x966   : > { %v2239_v24 = vpack.c.bf16 %v2230_v10, %v2229_v40 }
 0x968   : > { %3701 = vmatprep.mubr.bf16.mxu0 %v2239_v24 }
 0x969   : > { %3702 = vmatmul.mubr.bf16.gmra.mrb[60].mxu0 %v2240_v23 }
 0xa10   : > { %v3691_v48 = vpop.f32.mrb[48].mxu0 }
 0xa11   : > { %v2339_v37 = vpop.f32.mrb[49].mxu0 }
 0xa12   : > { %v3692_v17 = vpop.f32.mrb[50].mxu0 }
 0xa13   : > { %v2403_v60 = vpack.c.bf16 %v3692_v17, %v3691_v48  ;;  %v2342_v31 = vpop.f32.mrb[51].mxu0 }
 0xa14   : > { %v2402_v1 = vpack.c.bf16 %v2342_v31, %v2339_v37 }
 0xa16   : > { %3721 = vmatprep.mubr.bf16.mxu1 %v2402_v1  ;;  %3737 = vmatprep.subr.bf16.mxu0 %v2402_v1 }
 0xa17   : > { %3769 = vmatprep.subr.bf16.mxu1 %v2402_v1  ;;  %3722 = vmatmul.mubr.bf16.vlgmr.msra.gmra.mrb[48].mxu1 %v2403_v60 }
 0xa18   : > { %3738 = vmatpush3.bf16.msra.mxu0 %v2402_v1  ;;  %3777 = vmatpush3.bf16.msra.mxu1 %v2402_v1 }
 0xa19   : > { %3739 = vmatprep.subr.bf16.mxu0 %v2403_v60  ;;  %3770 = vmatprep.subr.bf16.mxu1 %v2403_v60 }
 0xa1c   : > { %3740 = vmatpush3.bf16.msra.mxu0 %v2403_v60  ;;  %3778 = vmatpush3.bf16.msra.mxu1 %v2403_v60 }
 0xa21   : > { %v3695_v11 = vpop.f32.mrb[52].mxu0 }
 0xa22   : > { %v2355_v57 = vpop.f32.mrb[53].mxu0 }
 0xa23   : > { %v3696_v13 = vpop.f32.mrb[54].mxu0 }
 0xa24   : > { %v2405_v16 = vpack.c.bf16 %v3696_v13, %v3695_v11  ;;  %v2358_v7 = vpop.f32.mrb[55].mxu0 }
 0xa25   : > { %v2404_v44 = vpack.c.bf16 %v2358_v7, %v2355_v57 }
 0xa27   : > { %3725 = vmatprep.mubr.bf16.mxu1 %v2404_v44  ;;  %3741 = vmatprep.subr.bf16.mxu0 %v2404_v44 }
 0xa28   : > { %3771 = vmatprep.subr.bf16.mxu1 %v2404_v44  ;;  %3726 = vmatmul.mubr.bf16.gmra.mrb[52].mxu1 %v2405_v16 }
 0xa29   : > { %3742 = vmatpush3.bf16.msra.mxu0 %v2404_v44  ;;  %3779 = vmatpush3.bf16.msra.mxu1 %v2404_v44 }
 0xa2a   : > { %3743 = vmatprep.subr.bf16.mxu0 %v2405_v16  ;;  %3772 = vmatprep.subr.bf16.mxu1 %v2405_v16 }
 0xa2d   : > { %3744 = vmatpush3.bf16.msra.mxu0 %v2405_v16  ;;  %3780 = vmatpush3.bf16.msra.mxu1 %v2405_v16 }
 0xa31   : > { %v3699_v34 = vpop.f32.mrb[56].mxu0 }
 0xa32   : > { %v2371_v12 = vpop.f32.mrb[57].mxu0 }
 0xa33   : > { %v3700_v54 = vpop.f32.mrb[58].mxu0 }
 0xa34   : > { %v2407_v36 = vpack.c.bf16 %v3700_v54, %v3699_v34  ;;  %v2374_v22 = vpop.f32.mrb[59].mxu0 }
 0xa35   : > { %v2406_v14 = vpack.c.bf16 %v2374_v22, %v2371_v12 }
 0xa37   : > { %3729 = vmatprep.mubr.bf16.mxu1 %v2406_v14  ;;  %3745 = vmatprep.subr.bf16.mxu0 %v2406_v14 }
 0xa38   : > { %3773 = vmatprep.subr.bf16.mxu1 %v2406_v14  ;;  %3730 = vmatmul.mubr.bf16.gmra.mrb[56].mxu1 %v2407_v36 }
 0xa39   : > { %3746 = vmatpush3.bf16.msra.mxu0 %v2406_v14  ;;  %3781 = vmatpush3.bf16.msra.mxu1 %v2406_v14 }
 0xa3a   : > { %3747 = vmatprep.subr.bf16.mxu0 %v2407_v36  ;;  %3774 = vmatprep.subr.bf16.mxu1 %v2407_v36 }
 0xa3c   : > { %v3703_v62 = vpop.f32.mrb[60].mxu0 }
 0xa3d   : > { %3748 = vmatpush3.bf16.msra.mxu0 %v2407_v36  ;;  %3782 = vmatpush3.bf16.msra.mxu1 %v2407_v36  ;;  %v2387_v43 = vpop.f32.mrb[61].mxu0 }
 0xa3e   : > { %v3704_v41 = vpop.f32.mrb[62].mxu0 }
 0xa3f   : > { %v2409_v3 = vpack.c.bf16 %v3704_v41, %v3703_v62  ;;  %v2390_v45 = vpop.f32.mrb[63].mxu0 }
 0xa40   : > { %v2408_v49 = vpack.c.bf16 %v2390_v45, %v2387_v43 }
 0xa42   : > { %3733 = vmatprep.mubr.bf16.mxu1 %v2408_v49  ;;  %3749 = vmatprep.subr.bf16.mxu0 %v2408_v49 }
 0xa43   : > { %3775 = vmatprep.subr.bf16.mxu1 %v2408_v49  ;;  %3734 = vmatmul.mubr.bf16.gmra.mrb[60].mxu1 %v2409_v3 }
 0xa44   : > { %3750 = vmatpush3.bf16.msra.mxu0 %v2408_v49  ;;  %3783 = vmatpush3.bf16.msra.mxu1 %v2408_v49 }
 0xa45   : > { %3751 = vmatprep.subr.bf16.mxu0 %v2409_v3  ;;  %3776 = vmatprep.subr.bf16.mxu1 %v2409_v3 }
 0xa48   : > { %3752 = vmatpush3.bf16.msra.mxu0 %v2409_v3  ;;  %3784 = vmatpush3.bf16.msra.mxu1 %v2409_v3 }
 0xaea   : > { %v3723_v50 = vpop.f32.mrb[48].mxu1 }
 0xaeb   : > { %2615 = vperm.xlu0 %3903, %v3723_v50   ;;  %v2508_v33 = vpop.f32.mrb[49].mxu1 }
 0xaec   : > { %2605 = vperm.xlu1 %3902, %v2508_v33   ;;  %v3724_v51 = vpop.f32.mrb[50].mxu1 }
 0xaed   : > { %v2511_v29 = vpop.f32.mrb[51].mxu1 }
 0xaef   : > { %2610 = vperm.xlu0 %3903, %v2511_v29  }
 0xaf0   : > { %2620 = vperm.xlu1 %3902, %v3724_v51  }
 0xafb   : > { %v3727_v56 = vpop.f32.mrb[52].mxu1 }
 0xafc   : > { %2635 = vperm.xlu0 %3903, %v3727_v56   ;;  %v2524_v9 = vpop.f32.mrb[53].mxu1 }
 0xafd   : > { %v3728_v61 = vpop.f32.mrb[54].mxu1 }
 0xafe   : > { %v2527_v20 = vpop.f32.mrb[55].mxu1 }
 0xaff   : > { %2630 = vperm.xlu1 %3902, %v2527_v20  }
 0xb00   : > { %2625 = vperm.xlu0 %3903, %v2524_v9  }
 0xb0b   : > { %v3731_v25 = vpop.f32.mrb[56].mxu1 }
 0xb0c   : > { %2655 = vperm.xlu0 %3903, %v3731_v25   ;;  %v2540_v15 = vpop.f32.mrb[57].mxu1 }
 0xb0d   : > { %2645 = vperm.xlu1 %3902, %v2540_v15   ;;  %v3732_v52 = vpop.f32.mrb[58].mxu1 }
 0xb0e   : > { %v2543_v63 = vpop.f32.mrb[59].mxu1 }
 0xb11   : > { %2660 = vperm.xlu1 %3902, %v3732_v52  }
 0xb15   : > { %2650 = vperm.xlu1 %3902, %v2543_v63  }
 0xb16   : > { %v3735_v2 = vpop.f32.mrb[60].mxu1 }
 0xb17   : > { %2675 = vperm.xlu0 %3903, %v3735_v2   ;;  %v2556_v4 = vpop.f32.mrb[61].mxu1 }
 0xb18   : > { %v3736_v6 = vpop.f32.mrb[62].mxu1 }
 0xb19   : > { %2640 = vperm.xlu1 %3902, %v3728_v61   ;;  %v2559_v21 = vpop.f32.mrb[63].mxu1 }
 0xb1b   : > { %2665 = vperm.xlu0 %3903, %v2556_v4  }
 0xb1d   : > { %2670 = vperm.xlu1 %3902, %v2559_v21  }
 0xb21   : > { %2680 = vperm.xlu1 %3902, %v3736_v6  }
 0xb39   : > { %2571 = vxpose.xlu0.b32.start [1/16] (narrow) %v2508_v33, 8 }
 0xb3d   : > { %2572 = vxpose.xlu0.b32.cont [2/16] (narrow) %v2511_v29, 8 }
 0xb41   : > { %2573 = vxpose.xlu0.b32.cont [3/16] (narrow) %v3723_v50, 8 }
 0xb45   : > { %2574 = vxpose.xlu0.b32.cont [4/16] (narrow) %v3724_v51, 8 }
 0xb49   : > { %2575 = vxpose.xlu0.b32.cont [5/16] (narrow) %v2524_v9, 8 }
 0xb4d   : > { %2576 = vxpose.xlu0.b32.cont [6/16] (narrow) %v2527_v20, 8 }
 0xb51   : > { %2577 = vxpose.xlu0.b32.cont [7/16] (narrow) %v3727_v56, 8 }
 0xb55   : > { %2578 = vxpose.xlu0.b32.cont [8/16] (narrow) %v3728_v61, 8 }
 0xb59   : > { %2579 = vxpose.xlu0.b32.cont [9/16] (narrow) %v2540_v15, 8 }
 0xb5d   : > { %2580 = vxpose.xlu0.b32.cont [10/16] (narrow) %v2543_v63, 8 }
 0xb61   : > { %2581 = vxpose.xlu0.b32.cont [11/16] (narrow) %v3731_v25, 8 }
 0xb65   : > { %2582 = vxpose.xlu0.b32.cont [12/16] (narrow) %v3732_v52, 8 }
 0xb69   : > { %2583 = vxpose.xlu0.b32.cont [13/16] (narrow) %v2556_v4, 8 }
 0xb6a   : > { %v2616_v40 = vpop.permute.xlu0 %2615 }
 0xb6b   : > { %v2606_v8 = vpop.permute.xlu1 %2605 }
 0xb6d   : > { %2584 = vxpose.xlu0.b32.cont [14/16] (narrow) %v2559_v21, 8 }
 0xb6e   : > { %v2611_v23 = vpop.permute.xlu0 %2610 }
 0xb6f   : > { %v2621_v38 = vpop.permute.xlu1 %2620 }
 0xb71   : > { %2585 = vxpose.xlu0.b32.cont [15/16] (narrow) %v3735_v2, 8 }
 0xb75   : > { %2586 = vxpose.xlu0.b32.end [16/16] (narrow) %v3736_v6, 8 }
 0xb7b   : > { %v2636_v30 = vpop.permute.xlu0 %2635 }
 0xb7e   : > { %v2631_v10 = vpop.permute.xlu1 %2630 }
 0xb7f   : > { %v2626_v37 = vpop.permute.xlu0 %2625 }
 0xb8b   : > { %v2656_v60 = vpop.permute.xlu0 %2655 }
 0xb8c   : > { %v2646_v24 = vpop.permute.xlu1 %2645 }
 0xb90   : > { %v2661_v48 = vpop.permute.xlu1 %2660 }
 0xb94   : > { %v5217_v17 = vpop.permute.xlu1 %2650 }
 0xb96   : > { %v5219_v31 = vpop.permute.xlu0 %2675 }
 0xb98   : > { %v2641_v1 = vpop.permute.xlu1 %2640 }
 0xb9a   : > { %v5221_v11 = vpop.permute.xlu0 %2665 }
 0xb9c   : > { %v5223_v57 = vpop.permute.xlu1 %2670 }
 0xba0   : > { %v2681_v7 = vpop.permute.xlu1 %2680 }
 0xbb9   : > { %v2587_v13 = vpop.trf.xlu0 }
 0xbba   : > { %v5226_v16 = vrot.slane %v2587_v13, %v4912_v18 }
 0xbbc   : > { %v2687_v44 = vadd.f32 %v5226_v16, %v2606_v8  ;;  %v2702_v34 = vadd.f32 %v5226_v16, %v2681_v7  ;;  %v2688_v12 = vadd.f32 %v5226_v16, %v2611_v23  ;;  %v2689_v14 = vadd.f32 %v5226_v16, %v2616_v40 }
 0xbbd   : > { %v2690_v41 = vadd.f32 %v5226_v16, %v2621_v38  ;;  %v2693_v29 = vadd.f32 %v5226_v16, %v2636_v30  ;;  %v2691_v9 = vadd.f32 %v5226_v16, %v2626_v37  ;;  %v2694_v25 = vadd.f32 %v5226_v16, %v2641_v1 }
 0xbbe   : > { %v2703_v54 = vmul.f32 0.2, %v2687_v44  ;;  %v2718_v36 = vmul.f32 0.2, %v2702_v34  ;;  %v2704_v22 = vmul.f32 0.2, %v2688_v12  ;;  %v2692_v63 = vadd.f32 %v5226_v16, %v2631_v10 }
 0xbbf   : > { %v2705_v49 = vmul.f32 0.2, %v2689_v14  ;;  %v2706_v51 = vmul.f32 0.2, %v2690_v41  ;;  %v2709_v56 = vmul.f32 0.2, %v2693_v29  ;;  %v2697_v6 = vadd.f32 %v5226_v16, %v2656_v60 }
 0xbc0   : > { %v2719_v62 = vmax.f32 %v2687_v44, %v2703_v54  ;;  %v2734_v43 = vmax.f32 %v2702_v34, %v2718_v36  ;;  %v2720_v45 = vmax.f32 %v2688_v12, %v2704_v22  ;;  %v2707_v20 = vmul.f32 0.2, %v2691_v9 }
 0xbc1   : > { %v2721_v33 = vmax.f32 %v2689_v14, %v2705_v49  ;;  %v2710_v52 = vmul.f32 0.2, %v2694_v25  ;;  %v2708_v4 = vmul.f32 0.2, %v2692_v63  ;;  %v2713_v8 = vmul.f32 0.2, %v2697_v6 }
 0xbc2   : > { %v5234_v3 = vadd.f32 %v4927_v28, %v2719_v62  ;;  %v5237_v18 = vadd.f32 %v4925_v27, %v2734_v43  ;;  %v5242_v50 = vadd.f32 %v4930_v35, %v2720_v45  ;;  %v2722_v27 = vmax.f32 %v2690_v41, %v2706_v51 }
 0xbc3   : > { %v5247_v28 = vadd.f32 %v4942_v42, %v2721_v33  ;;  %v2725_v35 = vmax.f32 %v2693_v29, %v2709_v56  ;;  %v2723_v42 = vmax.f32 %v2691_v9, %v2707_v20  ;;  %v2695_v38 = vadd.f32 %v5226_v16, %v2646_v24 }
 0xbc4   : > { %2751 = vmax.xlane.f32.xlu1 %v5234_v3  ;;  %2781 = vmax.xlane.f32.xlu0 %v5237_v18  ;;  %v5252_v61 = vadd.f32 %v4949_v47, %v2722_v27  ;;  %v2726_v47 = vmax.f32 %v2694_v25, %v2710_v52  ;;  %v2698_v23 = vadd.f32 %v5226_v16, %v2661_v48 }
 0xbc5   : > { %v5257_v15 = vadd.f32 %v4957_v53, %v2725_v35  ;;  %v5262_v2 = vadd.f32 %v4965_v59, %v2723_v42  ;;  %v2724_v53 = vmax.f32 %v2692_v63, %v2708_v4  ;;  %v2729_v59 = vmax.f32 %v2697_v6, %v2713_v8 }
 0xbc6   : > { %v5267_v21 = vadd.f32 %v4972_v0, %v2726_v47  ;;  %v2711_v10 = vmul.f32 0.2, %v2695_v38  ;;  %v2714_v37 = vmul.f32 0.2, %v2698_v23  ;;  %v2696_v60 = vadd.f32 %v5226_v16, %v5217_v17 }
 0xbc7   : > { %v5272_v40 = vadd.f32 %v4980_v5, %v2724_v53  ;;  %v5277_v30 = vadd.f32 %v4989_v19, %v2729_v59  ;;  %v2699_v48 = vadd.f32 %v5226_v16, %v5221_v11  ;;  %v2700_v17 = vadd.f32 %v5226_v16, %v5223_v57 }
 0xbc8   : > { %2753 = vmax.xlane.f32.xlu1 %v5242_v50  ;;  %v2727_v0 = vmax.f32 %v2695_v38, %v2711_v10  ;;  %v2730_v5 = vmax.f32 %v2698_v23, %v2714_v37  ;;  %v2712_v1 = vmul.f32 0.2, %v2696_v60  ;;  %v2701_v11 = vadd.f32 %v5226_v16, %v5219_v31 }
 0xbc9   : > { %v2715_v7 = vmul.f32 0.2, %v2699_v48  ;;  %v2716_v34 = vmul.f32 0.2, %v2700_v17 }
 0xbca   : > { %v5283_v24 = vadd.f32 %v4998_v26, %v2727_v0  ;;  %v5289_v19 = vadd.f32 %v5006_v32, %v2730_v5  ;;  %v2728_v13 = vmax.f32 %v2696_v60, %v2712_v1  ;;  %v2717_v54 = vmul.f32 0.2, %v2701_v11 }
 0xbcb   : > { %v2731_v44 = vmax.f32 %v2699_v48, %v2715_v7  ;;  %v2732_v12 = vmax.f32 %v2700_v17, %v2716_v34 }
 0xbcc   : > { %2755 = vmax.xlane.f32.xlu1 %v5247_v28  ;;  %v5295_v26 = vadd.f32 %v5014_v39, %v2728_v13  ;;  %v2733_v36 = vmax.f32 %v2701_v11, %v2717_v54 }
 0xbcd   : > { %v5301_v32 = vadd.f32 %v5023_v46, %v2731_v44  ;;  %v5305_v57 = vadd.f32 %v5034_v55, %v2732_v12 }
 0xbce   : > { %v5309_v39 = vadd.f32 %v5041_v58, %v2733_v36 }
 0xbd0   : > { %2757 = vmax.xlane.f32.xlu1 %v5252_v61 }
 0xbd4   : > { %2763 = vmax.xlane.f32.xlu1 %v5257_v15 }
 0xbd8   : > { %2759 = vmax.xlane.f32.xlu1 %v5262_v2 }
 0xbdc   : > { %2765 = vmax.xlane.f32.xlu1 %v5267_v21 }
 0xbe0   : > { %2761 = vmax.xlane.f32.xlu1 %v5272_v40 }
 0xbe4   : > { %2771 = vmax.xlane.f32.xlu1 %v5277_v30 }
 0xbe8   : > { %2767 = vmax.xlane.f32.xlu1 %v5283_v24 }
 0xbec   : > { %2773 = vmax.xlane.f32.xlu1 %v5289_v19 }
 0xbf0   : > { %2769 = vmax.xlane.f32.xlu1 %v5295_v26 }
 0xbf4   : > { %2775 = vmax.xlane.f32.xlu1 %v5301_v32 }
 0xbf8   : > { %2777 = vmax.xlane.f32.xlu1 %v5305_v57 }
 0xbfc   : > { %2779 = vmax.xlane.f32.xlu1 %v5309_v39 }
 0xc51   : > { %v2752_v31 = vpop.xlane.xlu1 %2751  ;;  %v2782_v7 = vpop.xlane.xlu0 %2781 }
 0xc52   : > { %v2783_v16 = vsub.f32 %v5234_v3, %v2752_v31  ;;  %v2798_v34 = vsub.f32 %v5237_v18, %v2782_v7 }
 0xc54   : > { %v2799_v46 = vmul.f32 1.442695, %v2783_v16  ;;  %v2829_v36 = vmul.f32 1.442695, %v2798_v34 }
 0xc55   : > { %v2754_v22 = vpop.xlane.xlu1 %2753 }
 0xc56   : > { %v2784_v14 = vsub.f32 %v5242_v50, %v2754_v22  ;;  %4088 = vpow2.f32 %v2799_v46 }
 0xc58   : > { %v2801_v62 = vmul.f32 1.442695, %v2784_v14 }
 0xc59   : > { %v2756_v43 = vpop.xlane.xlu1 %2755 }
 0xc5a   : > { %4090 = vpow2.f32 %v2801_v62  ;;  %v2785_v55 = vsub.f32 %v5247_v28, %v2756_v43 }
 0xc5c   : > { %v2803_v41 = vmul.f32 1.442695, %v2785_v55 }
 0xc5d   : > { %v2758_v45 = vpop.xlane.xlu1 %2757 }
 0xc5e   : > { %4092 = vpow2.f32 %v2803_v41  ;;  %v2786_v58 = vsub.f32 %v5252_v61, %v2758_v45 }
 0xc60   : > { %v2805_v49 = vmul.f32 1.442695, %v2786_v58  ;;  %v4089_v33 = vpop.eup %4088 }
 0xc61   : > { %v2764_v51 = vpop.xlane.xlu1 %2763  ;;  %2831 = vadd.xlane.f32.xlu1 %v4089_v33 }
 0xc62   : > { %4094 = vpow2.f32 %v2805_v49  ;;  %v2789_v3 = vsub.f32 %v5257_v15, %v2764_v51 }
 0xc64   : > { %v4091_v29 = vpop.eup %4090  ;;  %v2811_v50 = vmul.f32 1.442695, %v2789_v3 }
 0xc65   : > { %v2760_v27 = vpop.xlane.xlu1 %2759  ;;  %v2863_v56 = vpack.c.bf16 %v4091_v29, %v4089_v33  ;;  %2833 = vadd.xlane.f32.xlu1 %v4091_v29 }
 0xc66   : > { %4096 = vpow2.f32 %v2811_v50  ;;  %v2787_v28 = vsub.f32 %v5262_v2, %v2760_v27  ;;  %v5332_v27 = vld [vmem:[%s5472_s11] ss:$0 sm:$0xff] }
 0xc67   : > { %3753 = vmatprep.mubr.bf16.mxu0 %v2863_v56 }
 0xc68   : > { %v4093_v9 = vpop.eup %4092  ;;  %v2807_v35 = vmul.f32 1.442695, %v2787_v28 }
 0xc69   : > { %v2766_v20 = vpop.xlane.xlu1 %2765  ;;  %2835 = vadd.xlane.f32.xlu1 %v4093_v9 }
 0xc6a   : > { %4098 = vpow2.f32 %v2807_v35  ;;  %v2790_v61 = vsub.f32 %v5267_v21, %v2766_v20 }
 0xc6c   : > { %v4095_v25 = vpop.eup %4094  ;;  %v2813_v42 = vmul.f32 1.442695, %v2790_v61 }
 0xc6d   : > { %v2762_v52 = vpop.xlane.xlu1 %2761  ;;  %v2864_v15 = vpack.c.bf16 %v4095_v25, %v4093_v9  ;;  %2837 = vadd.xlane.f32.xlu1 %v4095_v25 }
 0xc6e   : > { %4100 = vpow2.f32 %v2813_v42  ;;  %v2788_v63 = vsub.f32 %v5272_v40, %v2762_v52 }
 0xc6f   : > { %3754 = vmatmul.mubr.bf16.vlgmr.msra.gmra.mrb[64].mxu0 %v2864_v15 }
 0xc70   : > { %v4097_v47 = vpop.eup %4096  ;;  %v2809_v4 = vmul.f32 1.442695, %v2788_v63 }
 0xc71   : > { %v2772_v2 = vpop.xlane.xlu1 %2771  ;;  %2843 = vadd.xlane.f32.xlu1 %v4097_v47 }
 0xc72   : > { %4102 = vpow2.f32 %v2809_v4  ;;  %v2793_v6 = vsub.f32 %v5277_v30, %v2772_v2 }
 0xc74   : > { %v4099_v53 = vpop.eup %4098  ;;  %v2819_v8 = vmul.f32 1.442695, %v2793_v6 }
 0xc75   : > { %v2768_v38 = vpop.xlane.xlu1 %2767  ;;  %2839 = vadd.xlane.f32.xlu1 %v4099_v53 }
 0xc76   : > { %4104 = vpow2.f32 %v2819_v8  ;;  %v2791_v21 = vsub.f32 %v5283_v24, %v2768_v38 }
 0xc78   : > { %v4101_v59 = vpop.eup %4100  ;;  %v2815_v10 = vmul.f32 1.442695, %v2791_v21 }
 0xc79   : > { %v2774_v23 = vpop.xlane.xlu1 %2773  ;;  %2845 = vadd.xlane.f32.xlu1 %v4101_v59  ;;  %v2866_v1 = vpack.c.bf16 %v4101_v59, %v4097_v47 }
 0xc7a   : > { %4106 = vpow2.f32 %v2815_v10  ;;  %v2794_v40 = vsub.f32 %v5289_v19, %v2774_v23 }
 0xc7c   : > { %v4103_v0 = vpop.eup %4102  ;;  %v2821_v37 = vmul.f32 1.442695, %v2794_v40 }
 0xc7d   : > { %v2770_v60 = vpop.xlane.xlu1 %2769  ;;  %v2865_v5 = vpack.c.bf16 %v4103_v0, %v4099_v53  ;;  %2841 = vadd.xlane.f32.xlu1 %v4103_v0 }
 0xc7e   : > { %4108 = vpow2.f32 %v2821_v37  ;;  %v2792_v30 = vsub.f32 %v5295_v26, %v2770_v60 }
 0xc7f   : > { %3757 = vmatprep.mubr.bf16.mxu0 %v2865_v5 }
 0xc80   : > { %v4105_v48 = vpop.eup %4104  ;;  %v2817_v13 = vmul.f32 1.442695, %v2792_v30  ;;  %3758 = vmatmul.mubr.bf16.gmra.mrb[68].mxu0 %v2866_v1 }
 0xc81   : > { %v2776_v24 = vpop.xlane.xlu1 %2775  ;;  %2851 = vadd.xlane.f32.xlu1 %v4105_v48 }
 0xc82   : > { %4110 = vpow2.f32 %v2817_v13  ;;  %v2795_v17 = vsub.f32 %v5301_v32, %v2776_v24 }
 0xc84   : > { %v4107_v19 = vpop.eup %4106  ;;  %v2823_v44 = vmul.f32 1.442695, %v2795_v17 }
 0xc85   : > { %v2778_v11 = vpop.xlane.xlu1 %2777  ;;  %2847 = vadd.xlane.f32.xlu1 %v4107_v19 }
 0xc86   : > { %4112 = vpow2.f32 %v2823_v44  ;;  %v2796_v26 = vsub.f32 %v5305_v57, %v2778_v11 }
 0xc88   : > { %v4109_v12 = vpop.eup %4108  ;;  %v2825_v54 = vmul.f32 1.442695, %v2796_v26 }
 0xc89   : > { %2853 = vadd.xlane.f32.xlu0 %v4109_v12  ;;  %v2780_v31 = vpop.xlane.xlu1 %2779  ;;  %v2868_v18 = vpack.c.bf16 %v4109_v12, %v4105_v48 }
 0xc8a   : > { %4114 = vpow2.f32 %v2825_v54  ;;  %v2797_v16 = vsub.f32 %v5309_v39, %v2780_v31 }
 0xc8b   : > { %4116 = vpow2.f32 %v2829_v36 }
 0xc8c   : > { %v4111_v46 = vpop.eup %4110  ;;  %v2827_v22 = vmul.f32 1.442695, %v2797_v16 }
 0xc8d   : > { %2849 = vadd.xlane.f32.xlu1 %v4111_v46  ;;  %v2867_v32 = vpack.c.bf16 %v4111_v46, %v4107_v19 }
 0xc8e   : > { %4118 = vpow2.f32 %v2827_v22 }
 0xc8f   : > { %3761 = vmatprep.mubr.bf16.mxu1 %v2867_v32 }
 0xc90   : > { %v4113_v14 = vpop.eup %4112  ;;  %3762 = vmatmul.mubr.bf16.vlgmr.msra.gmra.mrb[64].mxu1 %v2868_v18 }
 0xc91   : > { %2855 = vadd.xlane.f32.xlu1 %v4113_v14 }
 0xc94   : > { %v4115_v57 = vpop.eup %4114 }
 0xc95   : > { %2857 = vadd.xlane.f32.xlu0 %v4115_v57  ;;  %v2869_v62 = vpack.c.bf16 %v4115_v57, %v4113_v14  ;;  %v4117_v43 = vpop.eup %4116 }
 0xc97   : > { %3765 = vmatprep.mubr.bf16.mxu1 %v2869_v62 }
 0xc98   : > { %v4119_v55 = vpop.eup %4118 }
 0xc99   : > { %2861 = vadd.xlane.f32.xlu0 %v4117_v43  ;;  %2859 = vadd.xlane.f32.xlu1 %v4119_v55  ;;  %v2870_v39 = vpack.c.bf16 %v4117_v43, %v4119_v55 }
 0xc9b   : > { %3766 = vmatmul.mubr.bf16.gmra.mrb[68].mxu1 %v2870_v39 }
 0xcee   : > { %v2832_v41 = vpop.xlane.xlu1 %2831 }
 0xcf2   : > { %v2834_v45 = vpop.xlane.xlu1 %2833 }
 0xcf6   : > { %v2836_v58 = vpop.xlane.xlu1 %2835 }
 0xcf7   : > { %4120 = vrcp.f32 %v2836_v58 }
 0xcf8   : > { %4122 = vrcp.f32 %v2832_v41 }
 0xcfa   : > { %v2838_v49 = vpop.xlane.xlu1 %2837 }
 0xcfb   : > { %4124 = vrcp.f32 %v2838_v49 }
 0xcfc   : > { %4126 = vrcp.f32 %v2834_v45 }
 0xcfe   : > { %v2844_v33 = vpop.xlane.xlu1 %2843 }
 0xcff   : > { %4128 = vrcp.f32 %v2844_v33 }
 0xd01   : > { %v4121_v29 = vpop.eup %4120 }
 0xd02   : > { %v2840_v51 = vpop.xlane.xlu1 %2839  ;;  %v4123_v56 = vpop.eup %4122 }
 0xd03   : > { %4130 = vrcp.f32 %v2840_v51 }
 0xd05   : > { %v4125_v35 = vpop.eup %4124 }
 0xd06   : > { %v2846_v3 = vpop.xlane.xlu1 %2845  ;;  %v4127_v25 = vpop.eup %4126 }
 0xd07   : > { %4132 = vrcp.f32 %v2846_v3 }
 0xd09   : > { %v4129_v8 = vpop.eup %4128 }
 0xd0a   : > { %v2842_v4 = vpop.xlane.xlu1 %2841 }
 0xd0b   : > { %4134 = vrcp.f32 %v2842_v4 }
 0xd0d   : > { %v4131_v59 = vpop.eup %4130 }
 0xd0e   : > { %v2852_v53 = vpop.xlane.xlu1 %2851 }
 0xd0f   : > { %4136 = vrcp.f32 %v2852_v53 }
 0xd11   : > { %v4133_v40 = vpop.eup %4132 }
 0xd12   : > { %v2848_v38 = vpop.xlane.xlu1 %2847 }
 0xd13   : > { %4138 = vrcp.f32 %v2848_v38 }
 0xd15   : > { %v4135_v60 = vpop.eup %4134 }
 0xd16   : > { %v2854_v7 = vpop.xlane.xlu0 %2853 }
 0xd17   : > { %4140 = vrcp.f32 %v2854_v7 }
 0xd19   : > { %v4137_v26 = vpop.eup %4136 }
 0xd1a   : > { %v2850_v48 = vpop.xlane.xlu1 %2849 }
 0xd1b   : > { %4142 = vrcp.f32 %v2850_v48 }
 0xd1d   : > { %v4139_v36 = vpop.eup %4138 }
 0xd1e   : > { %v2856_v44 = vpop.xlane.xlu1 %2855 }
 0xd21   : > { %v4141_v46 = vpop.eup %4140 }
 0xd22   : > { %v2858_v34 = vpop.xlane.xlu0 %2857 }
 0xd25   : > { %v4143_v18 = vpop.eup %4142 }
 0xd26   : > { %v2860_v11 = vpop.xlane.xlu1 %2859  ;;  %v2862_v12 = vpop.xlane.xlu0 %2861 }
 0xd27   : > { %4144 = vrcp.f32 %v2860_v11 }
 0xd28   : > { %4146 = vrcp.f32 %v2856_v44 }
 0xd29   : > { %4148 = vrcp.f32 %v2862_v12 }
 0xd2a   : > { %4150 = vrcp.f32 %v2858_v34 }
 0xd31   : > { %v4145_v45 = vpop.eup %4144 }
 0xd32   : > { %v4147_v49 = vpop.eup %4146 }
 0xd33   : > { %v4149_v3 = vpop.eup %4148 }
 0xd42   : > { %v3755_v50 = vpop.f32.mrb[64].mxu0 }
 0xd43   : > { %v2986_v28 = vmul.f32 %v4121_v29, %v3755_v50  ;;  %v2905_v9 = vpop.f32.mrb[65].mxu0 }
 0xd44   : > { %v2984_v20 = vmul.f32 %v4123_v56, %v2905_v9  ;;  %v3756_v61 = vpop.f32.mrb[66].mxu0  ;;  %v4151_v56 = vpop.eup %4150 }
 0xd45   : > { %v3009_v42 = vadd.f32 %v5332_v27, %v2986_v28  ;;  %v2987_v52 = vmul.f32 %v4125_v35, %v3756_v61  ;;  %v2908_v15 = vpop.f32.mrb[67].mxu0 }
 0xd46   : > { %v3007_v63 = vadd.f32 %v5332_v27, %v2984_v20  ;;  %v2985_v47 = vmul.f32 %v4127_v25, %v2908_v15 }
 0xd47   : > { %3025 = vst [vmem:[%s5336_s29 + $0x10] sm:$0xff] %v3009_v42  ;;  %v3010_v2 = vadd.f32 %v5332_v27, %v2987_v52 }
 0xd48   : > { %3023 = vst [vmem:[%s5336_s29] sm:$0xff] %v3007_v63  ;;  %v3008_v6 = vadd.f32 %v5332_v27, %v2985_v47 }
 0xd49   : > { %3026 = vst [vmem:[%s5336_s29 + $0x18] sm:$0xff] %v3010_v2 }
 0xd4a   : > { %3024 = vst [vmem:[%s5336_s29 + $0x8] sm:$0xff] %v3008_v6 }
 0xd53   : > { %v3759_v21 = vpop.f32.mrb[68].mxu0 }
 0xd54   : > { %v2990_v10 = vmul.f32 %v4129_v8, %v3759_v21  ;;  %v2921_v23 = vpop.f32.mrb[69].mxu0 }
 0xd55   : > { %v2988_v0 = vmul.f32 %v4131_v59, %v2921_v23  ;;  %v3760_v37 = vpop.f32.mrb[70].mxu0 }
 0xd56   : > { %v3013_v5 = vadd.f32 %v5332_v27, %v2990_v10  ;;  %v2991_v30 = vmul.f32 %v4133_v40, %v3760_v37  ;;  %v2924_v1 = vpop.f32.mrb[71].mxu0 }
 0xd57   : > { %v3011_v13 = vadd.f32 %v5332_v27, %v2988_v0  ;;  %v2989_v24 = vmul.f32 %v4135_v60, %v2924_v1 }
 0xd58   : > { %3029 = vst [vmem:[%s5336_s29 + $0x30] sm:$0xff] %v3013_v5  ;;  %v3014_v17 = vadd.f32 %v5332_v27, %v2991_v30 }
 0xd59   : > { %3027 = vst [vmem:[%s5336_s29 + $0x20] sm:$0xff] %v3011_v13  ;;  %v3012_v19 = vadd.f32 %v5332_v27, %v2989_v24 }
 0xd5a   : > { %3030 = vst [vmem:[%s5336_s29 + $0x38] sm:$0xff] %v3014_v17 }
 0xd5b   : > { %3028 = vst [vmem:[%s5336_s29 + $0x28] sm:$0xff] %v3012_v19 }
 0xd63   : > { %v3763_v54 = vpop.f32.mrb[64].mxu1 }
 0xd64   : > { %v2994_v31 = vmul.f32 %v4137_v26, %v3763_v54  ;;  %v2937_v16 = vpop.f32.mrb[65].mxu1 }
 0xd65   : > { %v2992_v22 = vmul.f32 %v4139_v36, %v2937_v16  ;;  %v3764_v32 = vpop.f32.mrb[66].mxu1 }
 0xd66   : > { %v3017_v14 = vadd.f32 %v5332_v27, %v2994_v31  ;;  %v2995_v57 = vmul.f32 %v4141_v46, %v3764_v32  ;;  %v2940_v62 = vpop.f32.mrb[67].mxu1 }
 0xd67   : > { %v3015_v43 = vadd.f32 %v5332_v27, %v2992_v22  ;;  %v2993_v55 = vmul.f32 %v4143_v18, %v2940_v62 }
 0xd68   : > { %3033 = vst [vmem:[%s5336_s29 + $0x50] sm:$0xff] %v3017_v14  ;;  %v3018_v39 = vadd.f32 %v5332_v27, %v2995_v57 }
 0xd69   : > { %3031 = vst [vmem:[%s5336_s29 + $0x40] sm:$0xff] %v3015_v43  ;;  %v3016_v41 = vadd.f32 %v5332_v27, %v2993_v55 }
 0xd6a   : > { %3034 = vst [vmem:[%s5336_s29 + $0x58] sm:$0xff] %v3018_v39 }
 0xd6b   : > { %3032 = vst [vmem:[%s5336_s29 + $0x48] sm:$0xff] %v3016_v41 }
 0xd6e   : > { %v3767_v58 = vpop.f32.mrb[68].mxu1 }
 0xd6f   : > { %v2998_v33 = vmul.f32 %v4145_v45, %v3767_v58  ;;  %v2953_v51 = vpop.f32.mrb[69].mxu1 }
 0xd70   : > { %v2996_v29 = vmul.f32 %v4147_v49, %v2953_v51  ;;  %v3768_v50 = vpop.f32.mrb[70].mxu1 }
 0xd71   : > { %v3021_v28 = vadd.f32 %v5332_v27, %v2998_v33  ;;  %v2999_v9 = vmul.f32 %v4149_v3, %v3768_v50  ;;  %v2956_v35 = vpop.f32.mrb[71].mxu1 }
 0xd72   : > { %v3019_v20 = vadd.f32 %v5332_v27, %v2996_v29  ;;  %v2997_v61 = vmul.f32 %v4151_v56, %v2956_v35 }
 0xd73   : > { %3037 = vst [vmem:[%s5336_s29 + $0x70] sm:$0xff] %v3021_v28  ;;  %v3022_v25 = vadd.f32 %v5332_v27, %v2999_v9 }
 0xd74   : > { %3035 = vst [vmem:[%s5336_s29 + $0x60] sm:$0xff] %v3019_v20  ;;  %v3020_v42 = vadd.f32 %v5332_v27, %v2997_v61 }
 0xd75   : > { %3038 = vst [vmem:[%s5336_s29 + $0x78] sm:$0xff] %v3022_v25 }
 0xd76   : > { %3036 = vst [vmem:[%s5336_s29 + $0x68] sm:$0xff] %v3020_v42 }
 0xd77   : > { %4393 = shalt.err (!%p4390_p3)
}
 0xd78   : > { %s4394_s13 = scalar_lea.hbm %s5369_s24, 2048  ;;  %s4398_s22 = scalar_lea.hbm %s5473_s3, 8192 }
 0xd79   : > { %p4395_p12 = scmp.ne.s32.totalorder %s5369_s24, %s4394_s13  ;;  %p4399_p0 = scmp.lt.u32.totalorder %s5369_s24, %s5473_s3 }
 0xd7a   : > { %p4400_p5 = scmp.lt.u32.totalorder %s4398_s22, %s4394_s13  ;;  %p4402_p9 = scmp.lt.u32.totalorder %s4394_s13, %s5369_s24 }
 0xd7b   : > { %p4396_p1 = pnand %p4395_p12, %p5474_p10 }
 0xd7c   : > { %p4401_p2 = por %p4400_p5, %p4399_p0 }
 0xd7d   : > { %p4397_p13 = pneg %p4396_p1 }
 0xd7e   : > { %p4403_p4 = por %p4402_p9, %p4401_p2 }
 0xd80   : > { %p4404_p6 = pnand %p4403_p4, %p4397_p13 }
 0xd82   : > { %4407 = shalt.err (!%p4404_p6)
}
 0xd83   : > { %s4480_s29 = smov 128   ;;  %s4481_s0 = smov 8  }
 0xd84   : > { %3813 = dma.vmem_to_hbm [thread:$0]  (%p5474_p10), %s5371_s26, 2048, %s5369_s24, %s3040_s23, %s4480_s29, %s4480_s29, %s4481_s0  }
 0xd85 PF: > { %p3858_p8 = scmp.ge.s32.totalorder %s4466_s20, 2  ;;  %s3068_s15 = sand.u32 1, %s4454_s17  }
 0xd86   : > { %p5475_p7 = scmp.ne.s32.totalorder %s5457_s25, 0  ;;  %s3069_s6 = scalar_lea.sflag [#allocation4], %s3068_s15 }
 0xd88   : > { %p3842_p11 = pnand %p3858_p8, %p5475_p7 }
 0xd8a   : > { %4449 = dma.done.wait (!%p3842_p11), %s3069_s6, 2048  }
 0xd8b   : > { %4451 = vsyncadd (!%p3842_p11), %s3069_s6, 4294965248  ;;  %p30_p3 = scmp.ge.s32.totalorder %s4735_s16, 6   ;;  %s5476_s17 = smov %s4458_s18 }
 0xd8c   : > { %s5477_s18 = smov %s4462_s19  ;;  %s5478_s19 = smov %s4746_s10 }
 0xd8d   : > { %s5479_s20 = smov %s4735_s16  ;;  %32 = sbr.rel (!%p30_p3) target bundleno = 19 (0x13), region = 146 }
 0xd94   :  { %3074 = vsyncpa [#allocation3], 1 }
 0xd95   :  { %3076 = vsyncpa [#allocation3 + $0x1], 1 }
 0xd96   :  { %3077 = vsyncpa [#allocation6], 1 }
 0xd97   :  { %3079 = vsyncpa [#allocation6 + $0x1], 1 }
 0xd98   :  { %3080 = vsyncpa [#allocation9], 1 }
 0xd99   :  { %3081 = vsyncpa [#allocation12], 1 }
 0xd9a   :  { %3082 = vsyncpa [#allocation15], 1 }
 0xd9b   :  { %3083 = vsyncpa [#allocation4], 1 }
 0xd9c   :  { %3085 = vsyncpa [#allocation4 + $0x1], 1 }

</bundles_post_ra>
